<compile_context>
chip_gen: v5e
topology: v5e:2x2
jax: 0.10.0
libtpu: 0.0.40
codegen_flags: <defaults>
</compile_context>

<pallas_src>
from functools import partial

import numpy as np
import jax
import jax.numpy as jnp
from jax.experimental import pallas as pl
from jax.experimental.pallas import tpu as pltpu


def _round_up(x, m):
    return ((x + m - 1) // m) * m


# Torch LSTM gate order is [i, f, g, o]; the kernel uses [i, f, o, g] so the
# three sigmoid gates form one contiguous lane-dense slab.
_GATE_PERM = (0, 1, 3, 2)


# ---------------------------------------------------------------------------
# Fused kernel: all layers in one invocation, VMEM scratch carries [x | h].
# ---------------------------------------------------------------------------
def _fused_lstm_kernel(x_ref, h_prev_ref, c_prev_ref, w_ref, b_ref,
                       out_ref, h_out_ref, c_out_ref, xh_ref):
    num_in = x_ref.shape[-1]
    L, _, Hp = h_prev_ref.shape
    Kp = xh_ref.shape[-1]
    Xp = Kp - Hp

    # Packed matmul LHS [ x | h_layer ].  Zero once so padding columns are
    # deterministic zeros (they only hit zero weight rows, but must not be
    # uninitialised NaNs).  The (B, num_in) input is padded here in-kernel.
    xh_ref[...] = jnp.zeros_like(xh_ref)
    xh_ref[:, :num_in] = x_ref[...]

    for layer in range(L):                        # L is small: fully unrolled
        xh_ref[:, Xp:] = h_prev_ref[layer]

        w_l = w_ref[layer]                        # (Kp, 4*Hp), bf16
        gates = jnp.dot(xh_ref[...].astype(w_l.dtype), w_l,
                        preferred_element_type=jnp.float32) + b_ref[layer]

        # Gate columns pre-packed as [i, f, o, g]: one sigmoid over 3*Hp lanes.
        sig = jax.nn.sigmoid(gates[:, :3 * Hp])
        i_g = sig[:, 0 * Hp:1 * Hp]
        f_g = sig[:, 1 * Hp:2 * Hp]
        o_g = sig[:, 2 * Hp:3 * Hp]
        g_g = jnp.tanh(gates[:, 3 * Hp:])

        c_new = f_g * c_prev_ref[layer] + i_g * g_g
        h_new = o_g * jnp.tanh(c_new)

        h_out_ref[layer] = h_new
        c_out_ref[layer] = c_new
        if layer + 1 < L:
            # Next layer's input.  Any stale x columns in [Hp, Xp) hit the
            # zero rows [H, Xp) of the next layer's packed weight (inert).
            xh_ref[:, :Hp] = h_new
        else:
            out_ref[...] = h_new[:, :out_ref.shape[-1]]


@partial(jax.jit, static_argnums=(5,), donate_argnums=(1, 2))
def _fused_lstm_step(inp, h_prev, c_prev, w_packed, b_packed, out_dim):
    """inp: (B, num_inputs); h_prev/c_prev: padded (L, B, Hp), donated.
    Returns (output (B, out_dim), h_new (L, B, Hp), c_new (L, B, Hp))."""
    L, B, Hp = h_prev.shape
    Kp = w_packed.shape[1]
    vmem = pl.BlockSpec(memory_space=pltpu.MemorySpace.VMEM)

    return pl.pallas_call(
        _fused_lstm_kernel,
        out_shape=(jax.ShapeDtypeStruct((B, out_dim), jnp.float32),
                   jax.ShapeDtypeStruct((L, B, Hp), jnp.float32),
                   jax.ShapeDtypeStruct((L, B, Hp), jnp.float32)),
        in_specs=[vmem, vmem, vmem, vmem, vmem],
        out_specs=(vmem, vmem, vmem),
        scratch_shapes=[pltpu.VMEM((B, Kp), jnp.float32)],   # carried [x | h]
        # In-place state writeback: h_prev -> h_new, c_prev -> c_new.
        input_output_aliases={1: 1, 2: 2},
    )(inp.astype(jnp.float32), h_prev, c_prev, w_packed, b_packed)


# ---------------------------------------------------------------------------
# Controller module (parameter setup is plain host-side glue).
# ---------------------------------------------------------------------------
class Controller:
    def __init__(self, num_inputs, num_outputs, num_layers, key,
                 weight_dtype=jnp.bfloat16):
        self.num_inputs = num_inputs
        self.num_outputs = num_outputs
        self.num_layers = num_layers

        H = num_outputs
        Hp = _round_up(H, 128)                       # lane-dense hidden width
        Xp = max(_round_up(num_inputs, 128), Hp)     # lane-dense input width
        Kp = Xp + Hp
        self.Hp, self.Xp, self.Kp = Hp, Xp, Kp

        def gate_pack_cols(mat_t):
            # (rows, 4H) torch gate order -> (rows, 4Hp) kernel gate order.
            rows = mat_t.shape[0]
            out = np.zeros((rows, 4 * Hp), np.float32)
            for new_g, old_g in enumerate(_GATE_PERM):
                out[:, new_g * Hp:new_g * Hp + H] = mat_t[:, old_g * H:(old_g + 1) * H]
            return out

        stdev = 5.0 / np.sqrt(num_inputs + num_outputs)
        self.raw_params = []     # (w_ih (4H,in), w_hh (4H,H), bias (4H,)) f32 ref
        w_stack, b_stack = [], []
        for layer in range(num_layers):
            in_dim = num_inputs if layer == 0 else H
            key, k1, k2 = jax.random.split(key, 3)
            # Same shapes/init as torch nn.LSTM in the module (biases = 0).
            w_ih = jax.random.uniform(k1, (4 * H, in_dim), jnp.float32, -stdev, stdev)
            w_hh = jax.random.uniform(k2, (4 * H, H), jnp.float32, -stdev, stdev)
            b_ih = jnp.zeros((4 * H,), jnp.float32)
            b_hh = jnp.zeros((4 * H,), jnp.float32)
            self.raw_params.append((w_ih, w_hh, b_ih + b_hh))

            packed = np.zeros((Kp, 4 * Hp), np.float32)
            packed[:in_dim, :] = gate_pack_cols(np.asarray(w_ih).T)
            packed[Xp:Xp + H, :] = gate_pack_cols(np.asarray(w_hh).T)
            # Invariants the kernel relies on: padding rows of the x-slot are
            # zero (stale carried columns are inert) and padded gate columns
            # are zero (padded state columns stay exactly 0).
            assert not packed[in_dim:Xp, :].any()
            assert not packed[Xp + H:, :].any()
            w_stack.append(packed)
            b_stack.append(gate_pack_cols(np.asarray(b_ih + b_hh)[None, :]))

        self.w_packed = jnp.asarray(np.stack(w_stack, 0), dtype=weight_dtype)  # (L,Kp,4Hp)
        self.b_packed = jnp.asarray(np.stack(b_stack, 0))                      # (L,1,4Hp) f32

        key, kh, kc = jax.random.split(key, 3)
        h_init = jax.random.normal(kh, (num_layers, 1, H), jnp.float32) * 0.05
        c_init = jax.random.normal(kc, (num_layers, 1, H), jnp.float32) * 0.05
        # Initial state kept in the persistent padded layout (padded cols = 0).
        self.h_init = jnp.pad(h_init, ((0, 0), (0, 0), (0, Hp - H)))
        self.c_init = jnp.pad(c_init, ((0, 0), (0, 0), (0, Hp - H)))

    def create_hidden_state(self, batch_size):
        """Returns the persistent padded state (L, B, Hp)."""
        h = jnp.tile(self.h_init, (1, batch_size, 1))
        c = jnp.tile(self.c_init, (1, batch_size, 1))
        return (h, c)

    def dense_state(self, state):
        """Unpadded (L, B, H) view of the persistent padded state."""
        h, c = state
        return h[:, :, :self.num_outputs], c[:, :, :self.num_outputs]

    def network_size(self):
        return (self.num_inputs, self.num_outputs)

    def forward(self, inp, prev_state):
        """inp: (B, num_inputs); prev_state: padded (L, B, Hp) tuple (donated).
        Returns (output (B, H), new padded state)."""
        h_prev, c_prev = prev_state
        out, h_new, c_new = _fused_lstm_step(inp, h_prev, c_prev,
                                             self.w_packed, self.b_packed,
                                             self.num_outputs)
        return out, (h_new, c_new)


# ---------------------------------------------------------------------------
# Pure-JAX f32 reference (mirrors torch nn.LSTM single-step semantics).
# ---------------------------------------------------------------------------
def reference_forward(ctrl, inp, prev_state):
    h_prev, c_prev = prev_state           # unpadded (L, B, H)
    x = inp
    H = ctrl.num_outputs
    h_list, c_list = [], []
    for layer in range(ctrl.num_layers):
        w_ih, w_hh, b = ctrl.raw_params[layer]
        gates = x @ w_ih.T + h_prev[layer] @ w_hh.T + b[None, :]
        i_g = jax.nn.sigmoid(gates[:, 0 * H:1 * H])
        f_g = jax.nn.sigmoid(gates[:, 1 * H:2 * H])
        g_g = jnp.tanh(gates[:, 2 * H:3 * H])
        o_g = jax.nn.sigmoid(gates[:, 3 * H:4 * H])
        c_new = f_g * c_prev[layer] + i_g * g_g
        h_new = o_g * jnp.tanh(c_new)
        h_list.append(h_new)
        c_list.append(c_new)
        x = h_new
    return x, (jnp.stack(h_list, 0), jnp.stack(c_list, 0))


if __name__ == "__main__":
    B = 2
    NUM_INPUTS = 32
    NUM_OUTPUTS = 32   # hidden size
    NUM_LAYERS = 2

    key = jax.random.PRNGKey(0)
    key, k_param, k_inp = jax.random.split(key, 3)

    ctrl = Controller(NUM_INPUTS, NUM_OUTPUTS, NUM_LAYERS, k_param)
    prev_state = ctrl.create_hidden_state(B)
    inp = jax.random.normal(k_inp, (B, NUM_INPUTS), jnp.float32)

    # Reference BEFORE the kernel call: the prev-state buffers are donated to
    # the fused step (in-place state update), so read them first.
    h0, c0 = ctrl.dense_state(prev_state)
    out_ref, (h_ref, c_ref) = reference_forward(ctrl, inp, (h0, c0))
    out_ref = jax.block_until_ready(out_ref)

    out, (h_new, c_new) = ctrl.forward(inp, prev_state)
    out = jax.block_until_ready(out)
    h_new = jax.block_until_ready(h_new)
    c_new = jax.block_until_ready(c_new)

    assert out.shape == (B, NUM_OUTPUTS)
    assert h_new.shape == (NUM_LAYERS, B, ctrl.Hp)
    assert c_new.shape == (NUM_LAYERS, B, ctrl.Hp)

    h_np, c_np = np.asarray(h_new), np.asarray(c_new)
    # bf16 weights -> relaxed tolerance vs the f32 reference (typ. err ~1e-2).
    tol = dict(rtol=5e-2, atol=5e-2)
    np.testing.assert_allclose(np.asarray(out), np.asarray(out_ref), **tol)
    np.testing.assert_allclose(h_np[:, :, :NUM_OUTPUTS], np.asarray(h_ref), **tol)
    np.testing.assert_allclose(c_np[:, :, :NUM_OUTPUTS], np.asarray(c_ref), **tol)
    # Padded columns of the persistent state must stay exactly zero so the
    # state can be fed straight back into the next controller step.
    assert not h_np[:, :, NUM_OUTPUTS:].any()
    assert not c_np[:, :, NUM_OUTPUTS:].any()

    print("KERNEL_OK")
</pallas_src>

<mosaic_0001>
module attributes {stable_mosaic.version = 11 : i64} {
  func.func @_fused_lstm_kernel(%arg0: memref<2x32xf32, #tpu.memory_space<vmem>>, %arg1: memref<2x2x128xf32, #tpu.memory_space<vmem>>, %arg2: memref<2x2x128xf32, #tpu.memory_space<vmem>>, %arg3: memref<2x256x512xbf16, #tpu.memory_space<vmem>>, %arg4: memref<2x1x512xf32, #tpu.memory_space<vmem>>, %arg5: memref<2x32xf32, #tpu.memory_space<vmem>>, %arg6: memref<2x2x128xf32, #tpu.memory_space<vmem>>, %arg7: memref<2x2x128xf32, #tpu.memory_space<vmem>>, %arg8: memref<2x256xf32, #tpu.memory_space<vmem>>) attributes {dimension_semantics = [], scalar_prefetch = 0 : i64, scratch_operands = 1 : i64, tpu.core_type = #tpu.core_type<tc>} {
    %cst = arith.constant 0.000000e+00 : f32
    %0 = vector.broadcast %cst : f32 to vector<2x256xf32>
    %c0 = arith.constant 0 : index
    %c0_0 = arith.constant 0 : index
    %1 = vector.load %arg8[%c0, %c0_0] : memref<2x256xf32, #tpu.memory_space<vmem>>, vector<2x256xf32>
    tpu.vector_store %arg8[%c0, %c0_0], %0 {strides = array<i32>} : memref<2x256xf32, #tpu.memory_space<vmem>>, vector<2x256xf32>,
    %c0_1 = arith.constant 0 : index
    %c0_2 = arith.constant 0 : index
    %2 = vector.load %arg0[%c0_1, %c0_2] : memref<2x32xf32, #tpu.memory_space<vmem>>, vector<2x32xf32>
    %c0_3 = arith.constant 0 : index
    %c0_4 = arith.constant 0 : index
    %3 = vector.load %arg8[%c0_3, %c0_4] : memref<2x256xf32, #tpu.memory_space<vmem>>, vector<2x32xf32>
    tpu.vector_store %arg8[%c0_3, %c0_4], %2 {strides = array<i32>} : memref<2x256xf32, #tpu.memory_space<vmem>>, vector<2x32xf32>,
    %c0_5 = arith.constant 0 : index
    %c0_6 = arith.constant 0 : index
    %c0_7 = arith.constant 0 : index
    %4 = vector.load %arg1[%c0_5, %c0_6, %c0_7] : memref<2x2x128xf32, #tpu.memory_space<vmem>>, vector<1x2x128xf32>
    %5 = vector.shape_cast %4 : vector<1x2x128xf32> to vector<2x128xf32>
    %c0_8 = arith.constant 0 : index
    %c128 = arith.constant 128 : index
    %6 = vector.load %arg8[%c0_8, %c128] : memref<2x256xf32, #tpu.memory_space<vmem>>, vector<2x128xf32>
    tpu.vector_store %arg8[%c0_8, %c128], %5 {strides = array<i32>} : memref<2x256xf32, #tpu.memory_space<vmem>>, vector<2x128xf32>,
    %c0_9 = arith.constant 0 : index
    %c0_10 = arith.constant 0 : index
    %c0_11 = arith.constant 0 : index
    %7 = vector.load %arg3[%c0_9, %c0_10, %c0_11] : memref<2x256x512xbf16, #tpu.memory_space<vmem>>, vector<1x256x512xbf16>
    %8 = vector.shape_cast %7 : vector<1x256x512xbf16> to vector<256x512xbf16>
    %c0_12 = arith.constant 0 : index
    %c0_13 = arith.constant 0 : index
    %9 = vector.load %arg8[%c0_12, %c0_13] : memref<2x256xf32, #tpu.memory_space<vmem>>, vector<2x256xf32>
    %10 = arith.truncf %9 : vector<2x256xf32> to vector<2x256xbf16>
    %cst_14 = arith.constant dense<0.000000e+00> : vector<2x512xf32>
    %11 = tpu.matmul %10, %8, %cst_14 {dimension_numbers = #tpu.dot_dimension_numbers<[1], [0], [0], [1], [0, 0, 1, 1], [], []>} : vector<2x256xbf16>, vector<256x512xbf16>, vector<2x512xf32> -> vector<2x512xf32>
    %c0_15 = arith.constant 0 : index
    %c0_16 = arith.constant 0 : index
    %c0_17 = arith.constant 0 : index
    %12 = vector.load %arg4[%c0_15, %c0_16, %c0_17] : memref<2x1x512xf32, #tpu.memory_space<vmem>>, vector<1x1x512xf32>
    %13 = vector.shape_cast %12 : vector<1x1x512xf32> to vector<1x512xf32>
    %14 = vector.broadcast %13 : vector<1x512xf32> to vector<2x512xf32>
    %15 = arith.addf %11, %14 : vector<2x512xf32>
    %16 = vector.extract_strided_slice %15 {offsets = [0, 0], sizes = [2, 384], strides = [1, 1]} : vector<2x512xf32> to vector<2x384xf32>
    %17 = arith.negf %16 : vector<2x384xf32>
    %18 = math.exp %17 : vector<2x384xf32>
    %cst_18 = arith.constant 1.000000e+00 : f32
    %19 = vector.broadcast %cst_18 : f32 to vector<2x384xf32>
    %20 = arith.addf %19, %18 : vector<2x384xf32>
    %21 = arith.divf %19, %20 : vector<2x384xf32>
    %22 = vector.extract_strided_slice %21 {offsets = [0, 0], sizes = [2, 128], strides = [1, 1]} : vector<2x384xf32> to vector<2x128xf32>
    %23 = vector.extract_strided_slice %21 {offsets = [0, 128], sizes = [2, 128], strides = [1, 1]} : vector<2x384xf32> to vector<2x128xf32>
    %24 = vector.extract_strided_slice %21 {offsets = [0, 256], sizes = [2, 128], strides = [1, 1]} : vector<2x384xf32> to vector<2x128xf32>
    %25 = vector.extract_strided_slice %15 {offsets = [0, 384], sizes = [2, 128], strides = [1, 1]} : vector<2x512xf32> to vector<2x128xf32>
    %26 = math.tanh %25 : vector<2x128xf32>
    %c0_19 = arith.constant 0 : index
    %c0_20 = arith.constant 0 : index
    %c0_21 = arith.constant 0 : index
    %27 = vector.load %arg2[%c0_19, %c0_20, %c0_21] : memref<2x2x128xf32, #tpu.memory_space<vmem>>, vector<1x2x128xf32>
    %28 = vector.shape_cast %27 : vector<1x2x128xf32> to vector<2x128xf32>
    %29 = arith.mulf %23, %28 : vector<2x128xf32>
    %30 = arith.mulf %22, %26 : vector<2x128xf32>
    %31 = arith.addf %29, %30 : vector<2x128xf32>
    %32 = math.tanh %31 : vector<2x128xf32>
    %33 = arith.mulf %24, %32 : vector<2x128xf32>
    %c0_22 = arith.constant 0 : index
    %c0_23 = arith.constant 0 : index
    %c0_24 = arith.constant 0 : index
    %34 = vector.load %arg6[%c0_22, %c0_23, %c0_24] : memref<2x2x128xf32, #tpu.memory_space<vmem>>, vector<1x2x128xf32>
    %35 = vector.shape_cast %34 : vector<1x2x128xf32> to vector<2x128xf32>
    %36 = vector.shape_cast %33 : vector<2x128xf32> to vector<1x2x128xf32>
    tpu.vector_store %arg6[%c0_22, %c0_23, %c0_24], %36 {strides = array<i32>} : memref<2x2x128xf32, #tpu.memory_space<vmem>>, vector<1x2x128xf32>,
    %c0_25 = arith.constant 0 : index
    %c0_26 = arith.constant 0 : index
    %c0_27 = arith.constant 0 : index
    %37 = vector.load %arg7[%c0_25, %c0_26, %c0_27] : memref<2x2x128xf32, #tpu.memory_space<vmem>>, vector<1x2x128xf32>
    %38 = vector.shape_cast %37 : vector<1x2x128xf32> to vector<2x128xf32>
    %39 = vector.shape_cast %31 : vector<2x128xf32> to vector<1x2x128xf32>
    tpu.vector_store %arg7[%c0_25, %c0_26, %c0_27], %39 {strides = array<i32>} : memref<2x2x128xf32, #tpu.memory_space<vmem>>, vector<1x2x128xf32>,
    %c0_28 = arith.constant 0 : index
    %c0_29 = arith.constant 0 : index
    %40 = vector.load %arg8[%c0_28, %c0_29] : memref<2x256xf32, #tpu.memory_space<vmem>>, vector<2x128xf32>
    tpu.vector_store %arg8[%c0_28, %c0_29], %33 {strides = array<i32>} : memref<2x256xf32, #tpu.memory_space<vmem>>, vector<2x128xf32>,
    %c1 = arith.constant 1 : index
    %c0_30 = arith.constant 0 : index
    %c0_31 = arith.constant 0 : index
    %41 = vector.load %arg1[%c1, %c0_30, %c0_31] : memref<2x2x128xf32, #tpu.memory_space<vmem>>, vector<1x2x128xf32>
    %42 = vector.shape_cast %41 : vector<1x2x128xf32> to vector<2x128xf32>
    %c0_32 = arith.constant 0 : index
    %c128_33 = arith.constant 128 : index
    %43 = vector.load %arg8[%c0_32, %c128_33] : memref<2x256xf32, #tpu.memory_space<vmem>>, vector<2x128xf32>
    tpu.vector_store %arg8[%c0_32, %c128_33], %42 {strides = array<i32>} : memref<2x256xf32, #tpu.memory_space<vmem>>, vector<2x128xf32>,
    %c1_34 = arith.constant 1 : index
    %c0_35 = arith.constant 0 : index
    %c0_36 = arith.constant 0 : index
    %44 = vector.load %arg3[%c1_34, %c0_35, %c0_36] : memref<2x256x512xbf16, #tpu.memory_space<vmem>>, vector<1x256x512xbf16>
    %45 = vector.shape_cast %44 : vector<1x256x512xbf16> to vector<256x512xbf16>
    %c0_37 = arith.constant 0 : index
    %c0_38 = arith.constant 0 : index
    %46 = vector.load %arg8[%c0_37, %c0_38] : memref<2x256xf32, #tpu.memory_space<vmem>>, vector<2x256xf32>
    %47 = arith.truncf %46 : vector<2x256xf32> to vector<2x256xbf16>
    %cst_39 = arith.constant dense<0.000000e+00> : vector<2x512xf32>
    %48 = tpu.matmul %47, %45, %cst_39 {dimension_numbers = #tpu.dot_dimension_numbers<[1], [0], [0], [1], [0, 0, 1, 1], [], []>} : vector<2x256xbf16>, vector<256x512xbf16>, vector<2x512xf32> -> vector<2x512xf32>
    %c1_40 = arith.constant 1 : index
    %c0_41 = arith.constant 0 : index
    %c0_42 = arith.constant 0 : index
    %49 = vector.load %arg4[%c1_40, %c0_41, %c0_42] : memref<2x1x512xf32, #tpu.memory_space<vmem>>, vector<1x1x512xf32>
    %50 = vector.shape_cast %49 : vector<1x1x512xf32> to vector<1x512xf32>
    %51 = vector.broadcast %50 : vector<1x512xf32> to vector<2x512xf32>
    %52 = arith.addf %48, %51 : vector<2x512xf32>
    %53 = vector.extract_strided_slice %52 {offsets = [0, 0], sizes = [2, 384], strides = [1, 1]} : vector<2x512xf32> to vector<2x384xf32>
    %54 = arith.negf %53 : vector<2x384xf32>
    %55 = math.exp %54 : vector<2x384xf32>
    %cst_43 = arith.constant 1.000000e+00 : f32
    %56 = vector.broadcast %cst_43 : f32 to vector<2x384xf32>
    %57 = arith.addf %56, %55 : vector<2x384xf32>
    %58 = arith.divf %56, %57 : vector<2x384xf32>
    %59 = vector.extract_strided_slice %58 {offsets = [0, 0], sizes = [2, 128], strides = [1, 1]} : vector<2x384xf32> to vector<2x128xf32>
    %60 = vector.extract_strided_slice %58 {offsets = [0, 128], sizes = [2, 128], strides = [1, 1]} : vector<2x384xf32> to vector<2x128xf32>
    %61 = vector.extract_strided_slice %58 {offsets = [0, 256], sizes = [2, 128], strides = [1, 1]} : vector<2x384xf32> to vector<2x128xf32>
    %62 = vector.extract_strided_slice %52 {offsets = [0, 384], sizes = [2, 128], strides = [1, 1]} : vector<2x512xf32> to vector<2x128xf32>
    %63 = math.tanh %62 : vector<2x128xf32>
    %c1_44 = arith.constant 1 : index
    %c0_45 = arith.constant 0 : index
    %c0_46 = arith.constant 0 : index
    %64 = vector.load %arg2[%c1_44, %c0_45, %c0_46] : memref<2x2x128xf32, #tpu.memory_space<vmem>>, vector<1x2x128xf32>
    %65 = vector.shape_cast %64 : vector<1x2x128xf32> to vector<2x128xf32>
    %66 = arith.mulf %60, %65 : vector<2x128xf32>
    %67 = arith.mulf %59, %63 : vector<2x128xf32>
    %68 = arith.addf %66, %67 : vector<2x128xf32>
    %69 = math.tanh %68 : vector<2x128xf32>
    %70 = arith.mulf %61, %69 : vector<2x128xf32>
    %c1_47 = arith.constant 1 : index
    %c0_48 = arith.constant 0 : index
    %c0_49 = arith.constant 0 : index
    %71 = vector.load %arg6[%c1_47, %c0_48, %c0_49] : memref<2x2x128xf32, #tpu.memory_space<vmem>>, vector<1x2x128xf32>
    %72 = vector.shape_cast %71 : vector<1x2x128xf32> to vector<2x128xf32>
    %73 = vector.shape_cast %70 : vector<2x128xf32> to vector<1x2x128xf32>
    tpu.vector_store %arg6[%c1_47, %c0_48, %c0_49], %73 {strides = array<i32>} : memref<2x2x128xf32, #tpu.memory_space<vmem>>, vector<1x2x128xf32>,
    %c1_50 = arith.constant 1 : index
    %c0_51 = arith.constant 0 : index
    %c0_52 = arith.constant 0 : index
    %74 = vector.load %arg7[%c1_50, %c0_51, %c0_52] : memref<2x2x128xf32, #tpu.memory_space<vmem>>, vector<1x2x128xf32>
    %75 = vector.shape_cast %74 : vector<1x2x128xf32> to vector<2x128xf32>
    %76 = vector.shape_cast %68 : vector<2x128xf32> to vector<1x2x128xf32>
    tpu.vector_store %arg7[%c1_50, %c0_51, %c0_52], %76 {strides = array<i32>} : memref<2x2x128xf32, #tpu.memory_space<vmem>>, vector<1x2x128xf32>,
    %77 = vector.extract_strided_slice %70 {offsets = [0, 0], sizes = [2, 32], strides = [1, 1]} : vector<2x128xf32> to vector<2x32xf32>
    %c0_53 = arith.constant 0 : index
    %c0_54 = arith.constant 0 : index
    %78 = vector.load %arg5[%c0_53, %c0_54] : memref<2x32xf32, #tpu.memory_space<vmem>>, vector<2x32xf32>
    tpu.vector_store %arg5[%c0_53, %c0_54], %77 {strides = array<i32>} : memref<2x32xf32, #tpu.memory_space<vmem>>, vector<2x32xf32>,
    return
  }
}

</mosaic_0001>

<bundles_post_ra>
// kernel: _fused_lstm_step.1
= control target key start
LH: loop header
LB: loop body
LE: loop exit
PB: predicated region body
PF: predicated region fallthrough
CT: control target
= control target key end

     0   :  { %13 = vsyncpa [#allocation4], 0  ;;  %s2402_s0 = inlined_call_operand.hbm [shape: f32[2,32], index: 0, kind: input, shape index: {}]   ;;  %s2403_s1 = inlined_call_operand.hbm [shape: f32[2,2,128], index: 1, kind: input, shape index: {}, may-alias: {1,6}]   ;;  %s2404_s2 = inlined_call_operand.hbm [shape: f32[2,2,128], index: 2, kind: input, shape index: {}, may-alias: {2,7}]   ;;  %s2405_s3 = inlined_call_operand.hbm [shape: bf16[2,256,512], index: 3, kind: input, shape index: {}]   ;;  %s2406_s4 = inlined_call_operand.hbm [shape: f32[2,1,512], index: 4, kind: input, shape index: {}]   ;;  %s2407_s5 = inlined_call_operand.hbm [shape: f32[2,32], index: 5, kind: output, shape index: {0}]   ;;  %s2408_s6 = inlined_call_operand.hbm [shape: f32[2,2,128], index: 6, kind: output, shape index: {1}, may-alias: {1,6}]   ;;  %s2409_s7 = inlined_call_operand.hbm [shape: f32[2,2,128], index: 7, kind: output, shape index: {2}, may-alias: {2,7}]  }
   0x1   :  { %14 = vsyncpa [#allocation7], 0 }
   0x2   :  { %15 = vsyncpa [#allocation10], 0 }
   0x3   :  { %16 = vsyncpa [#allocation5], 0  ;;  %s33_s26 = sshll.u32 %s2403_s1, 4  ;;  %s34_s26 = int_to_ptr.hbm [resolvable:$true] %s33_s26 }
   0x4   :  { %17 = vsyncpa [#allocation14], 0  ;;  %s2212_s27 = smov [#allocation6]   ;;  %s59_s8 = sshll.u32 %s2405_s3, 4  ;;  %s60_s8 = int_to_ptr.hbm [resolvable:$true] %s59_s8 }
   0x5   :  { %s35_s28 = sshll.u32 %s2212_s27, 4  ;;  %s2213_s9 = smov 32   ;;  %s36_s28 = int_to_ptr.vmem [resolvable:$true] %s35_s28 }
   0x6   :  { %s2214_s10 = smov 2   ;;  %s2215_s11 = smov [#allocation9]  }
   0x7   :  { %41 = dma.hbm_to_vmem [thread:$0]  %s34_s26, 64, %s36_s28, [#allocation7], %s2213_s9, %s2213_s9, %s2214_s10  }
   0x8   :  { %s61_s12 = sshll.u32 %s2215_s11, 4  ;;  %s2216_s1 = smov 256   ;;  %s62_s12 = int_to_ptr.vmem [resolvable:$true] %s61_s12 }
   0x9   :  { %s2217_s13 = smov 16   ;;  %s23_s16 = sshll.u32 %s2402_s0, 4  ;;  %s24_s16 = int_to_ptr.hbm [resolvable:$true] %s23_s16 }
   0xa   :  { %67 = dma.hbm_to_vmem [thread:$0]  %s60_s8, 16384, %s62_s12, [#allocation10], %s2216_s1, %s2216_s1, %s2217_s13  }
   0xb   :  { %s2218_s17 = smov [#allocation3]   ;;  %s46_s20 = sshll.u32 %s2404_s2, 4  ;;  %s47_s20 = int_to_ptr.hbm [resolvable:$true] %s46_s20 }
   0xc   :  { %s25_s3 = sshll.u32 %s2218_s17, 4  ;;  %s2219_s21 = smov [#allocation8]   ;;  %s26_s3 = int_to_ptr.vmem [resolvable:$true] %s25_s3 }
   0xd   :  { %28 = dma.hbm_to_vmem [thread:$0]  %s24_s16, 32, %s26_s3, [#allocation4]  }
   0xe   :  { %s48_s22 = sshll.u32 %s2219_s21, 4  ;;  %s72_s25 = sshll.u32 %s2406_s4, 4  ;;  %s49_s22 = int_to_ptr.vmem [resolvable:$true] %s48_s22  ;;  %s73_s25 = int_to_ptr.hbm [resolvable:$true] %s72_s25 }
   0xf   :  { %54 = dma.hbm_to_vmem [thread:$0]  %s47_s20, 64, %s49_s22, [#allocation7], %s2213_s9, %s2213_s9, %s2214_s10  }
  0x10   :  { %s2220_s0 = smov [#allocation11]   ;;  %s2221_s27 = smov 64  }
  0x11   :  { %s74_s26 = sshll.u32 %s2220_s0, 4  ;;  %s2222_s28 = smov 4   ;;  %s75_s26 = int_to_ptr.vmem [resolvable:$true] %s74_s26 }
  0x12   :  { %80 = dma.hbm_to_vmem [thread:$0]  %s73_s25, 128, %s75_s26, [#allocation10], %s2221_s27, %s2221_s27, %s2222_s28  }
  0x13   :  { %2202 = dma.done.wait [#allocation4], 32  }
  0x14   :  { %2203 = vsyncadd [#allocation4], 4294967264 }
  0x15   :  { %2204 = dma.done.wait [#allocation7], 128  }
  0x16   :  { %2205 = vsyncadd [#allocation7], 4294967168 }
  0x17   :  { %2206 = dma.done.wait [#allocation10], 16512  }
  0x18   :  { %2207 = vsyncadd [#allocation10], 4294950784  ;;  %v2223_v0 = vmov 0.0   ;;  %v1431_v1 = vld [vmem:[#allocation9 + $0xe0] sm:$0xf]  ;;  %vm103_vm0 = vcmask 254976  }
  0x19   :  { %101 = vst [vmem:[#allocation2] sm:$0xf] %v2223_v0  ;;  %v1865_v2 = vld [vmem:[#allocation9 + $0xec] sm:$0xf0]  ;;  %v1559_v3 = vld [vmem:[#allocation9 + $0x1e0] sm:$0xf] }
  0x1a   :  { %v1432_v4 = vor.u32 %v1865_v2, %v1431_v1  ;;  %v1897_v5 = vld [vmem:[#allocation9 + $0x1ec] sm:$0xf0]  ;;  %v1863_v6 = vld [vmem:[#allocation9 + $0xe4] sm:$0xf]  ;;  %v1433_v7 = vld [vmem:[#allocation9 + $0xf0] sm:$0xf0] }
  0x1b   :  { %v1560_v8 = vor.u32 %v1897_v5, %v1559_v3  ;;  %v1436_v9 = vor.u32 %v1863_v6, %v1433_v7  ;;  %v1895_v10 = vld [vmem:[#allocation9 + $0x1e4] sm:$0xf]  ;;  %v1561_v11 = vld [vmem:[#allocation9 + $0x1f0] sm:$0xf0]  ;;  %v1415_v12 = vld [vmem:[#allocation9 + $0xc0] sm:$0xf] }
  0x1c   :  { %510 = vmatpush.bf16.msra.mxu0 %v1432_v4  ;;  %v1564_v13 = vor.u32 %v1895_v10, %v1561_v11  ;;  %v1861_v14 = vld [vmem:[#allocation9 + $0xcc] sm:$0xf0]  ;;  %v1543_v15 = vld [vmem:[#allocation9 + $0x1c0] sm:$0xf]  ;;  %v1859_v19 = vld [vmem:[#allocation9 + $0xc4] sm:$0xf] }
  0x1d   :  { %v1893_v16 = vld [vmem:[#allocation9 + $0x1cc] sm:$0xf0]  ;;  %523 = vmatpush.bf16.msra.mxu1 %v1560_v8  ;;  %536 = vmatpush.bf16.msra.mxu2 %v1436_v9  ;;  %v1416_v17 = vor.u32 %v1861_v14, %v1415_v12  ;;  %v1417_v20 = vld [vmem:[#allocation9 + $0xd0] sm:$0xf0]  ;;  %v1891_v21 = vld [vmem:[#allocation9 + $0x1c4] sm:$0xf] }
  0x1e   :  { %v1544_v18 = vor.u32 %v1893_v16, %v1543_v15  ;;  %549 = vmatpush.bf16.msra.mxu3 %v1564_v13  ;;  %v1420_v22 = vor.u32 %v1859_v19, %v1417_v20  ;;  %v1545_v23 = vld [vmem:[#allocation9 + $0x1d0] sm:$0xf0]  ;;  %v1399_v24 = vld [vmem:[#allocation9 + $0xa0] sm:$0xf]  ;;  %v1857_v25 = vld [vmem:[#allocation9 + $0xac] sm:$0xf0] }
  0x1f   :  { %v1548_v26 = vor.u32 %v1891_v21, %v1545_v23  ;;  %v1527_v27 = vld [vmem:[#allocation9 + $0x1a0] sm:$0xf]  ;;  %v1889_v28 = vld [vmem:[#allocation9 + $0x1ac] sm:$0xf0]  ;;  %v1855_v29 = vld [vmem:[#allocation9 + $0xa4] sm:$0xf]  ;;  %v1400_v30 = vor.u32 %v1857_v25, %v1399_v24 }
  0x20   :  { %511 = vmatpush.bf16.msra.mxu0 %v1416_v17  ;;  %v1401_v31 = vld [vmem:[#allocation9 + $0xb0] sm:$0xf0]  ;;  %v1887_v32 = vld [vmem:[#allocation9 + $0x1a4] sm:$0xf]  ;;  %v1528_v34 = vor.u32 %v1889_v28, %v1527_v27  ;;  %v1383_v36 = vld [vmem:[#allocation9 + $0x80] sm:$0xf] }
  0x21   :  { %v1529_v33 = vld [vmem:[#allocation9 + $0x1b0] sm:$0xf0]  ;;  %524 = vmatpush.bf16.msra.mxu1 %v1544_v18  ;;  %537 = vmatpush.bf16.msra.mxu2 %v1420_v22  ;;  %v1404_v35 = vor.u32 %v1855_v29, %v1401_v31  ;;  %v1853_v37 = vld [vmem:[#allocation9 + $0x8c] sm:$0xf0]  ;;  %v1511_v38 = vld [vmem:[#allocation9 + $0x180] sm:$0xf] }
  0x22   :  { %550 = vmatpush.bf16.msra.mxu3 %v1548_v26  ;;  %v1532_v39 = vor.u32 %v1887_v32, %v1529_v33  ;;  %v1885_v40 = vld [vmem:[#allocation9 + $0x18c] sm:$0xf0]  ;;  %v1851_v41 = vld [vmem:[#allocation9 + $0x84] sm:$0xf]  ;;  %v1385_v42 = vld [vmem:[#allocation9 + $0x90] sm:$0xf0]  ;;  %v1384_v45 = vor.u32 %v1853_v37, %v1383_v36 }
  0x23   :  { %v1883_v43 = vld [vmem:[#allocation9 + $0x184] sm:$0xf]  ;;  %v1513_v44 = vld [vmem:[#allocation9 + $0x190] sm:$0xf0]  ;;  %v1512_v46 = vor.u32 %v1885_v40, %v1511_v38  ;;  %v1388_v47 = vor.u32 %v1851_v41, %v1385_v42  ;;  %v1367_v48 = vld [vmem:[#allocation9 + $0x60] sm:$0xf] }
  0x24   :  { %512 = vmatpush.bf16.msra.mxu0 %v1400_v30  ;;  %v1849_v49 = vld [vmem:[#allocation9 + $0x6c] sm:$0xf0]  ;;  %v1495_v50 = vld [vmem:[#allocation9 + $0x160] sm:$0xf]  ;;  %v1516_v51 = vor.u32 %v1883_v43, %v1513_v44  ;;  %v1847_v53 = vld [vmem:[#allocation9 + $0x64] sm:$0xf] }
  0x25   :  { %525 = vmatpush.bf16.msra.mxu1 %v1528_v34  ;;  %538 = vmatpush.bf16.msra.mxu2 %v1404_v35  ;;  %v1881_v52 = vld [vmem:[#allocation9 + $0x16c] sm:$0xf0]  ;;  %v1369_v54 = vld [vmem:[#allocation9 + $0x70] sm:$0xf0]  ;;  %v1879_v55 = vld [vmem:[#allocation9 + $0x164] sm:$0xf]  ;;  %v1368_v57 = vor.u32 %v1849_v49, %v1367_v48 }
  0x26   :  { %551 = vmatpush.bf16.msra.mxu3 %v1532_v39  ;;  %v1497_v56 = vld [vmem:[#allocation9 + $0x170] sm:$0xf0]  ;;  %v1496_v58 = vor.u32 %v1881_v52, %v1495_v50  ;;  %v1372_v59 = vor.u32 %v1847_v53, %v1369_v54  ;;  %v1351_v60 = vld [vmem:[#allocation9 + $0x40] sm:$0xf]  ;;  %v1845_v61 = vld [vmem:[#allocation9 + $0x4c] sm:$0xf0] }
  0x27   :  { %v1479_v62 = vld [vmem:[#allocation9 + $0x140] sm:$0xf]  ;;  %v1500_v63 = vor.u32 %v1879_v55, %v1497_v56  ;;  %v1877_v0 = vld [vmem:[#allocation9 + $0x14c] sm:$0xf0]  ;;  %v1843_v1 = vld [vmem:[#allocation9 + $0x44] sm:$0xf]  ;;  %v1352_v5 = vor.u32 %v1845_v61, %v1351_v60 }
  0x28   :  { %513 = vmatpush.bf16.msra.mxu0 %v1384_v45  ;;  %v1353_v2 = vld [vmem:[#allocation9 + $0x50] sm:$0xf0]  ;;  %v1875_v3 = vld [vmem:[#allocation9 + $0x144] sm:$0xf]  ;;  %v1335_v6 = vld [vmem:[#allocation9 + $0x20] sm:$0xf]  ;;  %v1480_v7 = vor.u32 %v1877_v0, %v1479_v62 }
  0x29   :  { %526 = vmatpush.bf16.msra.mxu1 %v1512_v46  ;;  %539 = vmatpush.bf16.msra.mxu2 %v1388_v47  ;;  %v1481_v4 = vld [vmem:[#allocation9 + $0x150] sm:$0xf0]  ;;  %v1356_v8 = vor.u32 %v1843_v1, %v1353_v2  ;;  %v1841_v9 = vld [vmem:[#allocation9 + $0x2c] sm:$0xf0]  ;;  %v1463_v10 = vld [vmem:[#allocation9 + $0x120] sm:$0xf] }
  0x2a   :  { %552 = vmatpush.bf16.msra.mxu3 %v1516_v51  ;;  %v1873_v11 = vld [vmem:[#allocation9 + $0x12c] sm:$0xf0]  ;;  %v1484_v12 = vor.u32 %v1875_v3, %v1481_v4  ;;  %v1839_v13 = vld [vmem:[#allocation9 + $0x24] sm:$0xf]  ;;  %v1337_v14 = vld [vmem:[#allocation9 + $0x30] sm:$0xf0]  ;;  %v1336_v19 = vor.u32 %v1841_v9, %v1335_v6 }
  0x2b   :  { %v1871_v15 = vld [vmem:[#allocation9 + $0x124] sm:$0xf]  ;;  %v1465_v16 = vld [vmem:[#allocation9 + $0x130] sm:$0xf0]  ;;  %v1319_v17 = vld [vmem:[#allocation9] sm:$0xf]  ;;  %v1464_v24 = vor.u32 %v1873_v11, %v1463_v10  ;;  %v1340_v25 = vor.u32 %v1839_v13, %v1337_v14 }
  0x2c   :  { %514 = vmatpush.bf16.msra.mxu0 %v1368_v57  ;;  %v1837_v18 = vld [vmem:[#allocation9 + $0xc] sm:$0xf0]  ;;  %v1447_v20 = vld [vmem:[#allocation9 + $0x100] sm:$0xf]  ;;  %v1835_v22 = vld [vmem:[#allocation9 + $0x4] sm:$0xf]  ;;  %v1468_v29 = vor.u32 %v1871_v15, %v1465_v16 }
  0x2d   :  { %527 = vmatpush.bf16.msra.mxu1 %v1496_v58  ;;  %540 = vmatpush.bf16.msra.mxu2 %v1372_v59  ;;  %v1869_v21 = vld [vmem:[#allocation9 + $0x10c] sm:$0xf0]  ;;  %v1321_v23 = vld [vmem:[#allocation9 + $0x10] sm:$0xf0]  ;;  %v1867_v26 = vld [vmem:[#allocation9 + $0x104] sm:$0xf]  ;;  %v1320_v34 = vor.u32 %v1837_v18, %v1319_v17 }
  0x2e   :  { %553 = vmatpush.bf16.msra.mxu3 %v1500_v63  ;;  %v102_v27 = vld [vmem:[#allocation3] sm:$0x3]  ;;  %v105_v28 = vld [vmem:[#allocation6] sm:$0x3]  ;;  %v1439_v31 = vld [vmem:[#allocation9 + $0xe8] sm:$0xf]  ;;  %v1448_v38 = vor.u32 %v1869_v21, %v1447_v20  ;;  %v1324_v39 = vor.u32 %v1835_v22, %v1321_v23 }
  0x2f   :  { %v1449_v30 = vld [vmem:[#allocation9 + $0x110] sm:$0xf0]  ;;  %104 = vst.msk [vmem:[#allocation2] sm:$0x3] %vm103_vm0, %v102_v27  ;;  %v1866_v32 = vld [vmem:[#allocation9 + $0xf4] sm:$0xf0] }
  0x30   :  { %515 = vmatpush.bf16.msra.mxu0 %v1352_v5  ;;  %v1567_v33 = vld [vmem:[#allocation9 + $0x1e8] sm:$0xf]  ;;  %106 = vst [vmem:[#allocation2 + $0x2] sm:$0x3] %v105_v28  ;;  %v1898_v35 = vld [vmem:[#allocation9 + $0x1f4] sm:$0xf0]  ;;  %v1452_v42 = vor.u32 %v1867_v26, %v1449_v30  ;;  %v1440_v43 = vor.u32 %v1866_v32, %v1439_v31 }
  0x31   :  { %528 = vmatpush.bf16.msra.mxu1 %v1480_v7  ;;  %541 = vmatpush.bf16.msra.mxu2 %v1356_v8  ;;  %v1864_v36 = vld [vmem:[#allocation9 + $0xec] sm:$0xf]  ;;  %v1441_v37 = vld [vmem:[#allocation9 + $0xf8] sm:$0xf0]  ;;  %v1568_v44 = vor.u32 %v1898_v35, %v1567_v33  ;;  %v1423_v46 = vld [vmem:[#allocation9 + $0xc8] sm:$0xf] }
  0x32   :  { %554 = vmatpush.bf16.msra.mxu3 %v1484_v12  ;;  %v1896_v40 = vld [vmem:[#allocation9 + $0x1ec] sm:$0xf]  ;;  %v1569_v41 = vld [vmem:[#allocation9 + $0x1f8] sm:$0xf0]  ;;  %v1444_v45 = vor.u32 %v1864_v36, %v1441_v37  ;;  %v1862_v47 = vld [vmem:[#allocation9 + $0xd4] sm:$0xf0] }
  0x33   :  { %v1551_v48 = vld [vmem:[#allocation9 + $0x1c8] sm:$0xf]  ;;  %v1572_v49 = vor.u32 %v1896_v40, %v1569_v41  ;;  %v1894_v50 = vld [vmem:[#allocation9 + $0x1d4] sm:$0xf0]  ;;  %v1860_v51 = vld [vmem:[#allocation9 + $0xcc] sm:$0xf]  ;;  %v1424_v57 = vor.u32 %v1862_v47, %v1423_v46 }
  0x34   :  { %516 = vmatpush.bf16.msra.mxu0 %v1336_v19  ;;  %v1425_v52 = vld [vmem:[#allocation9 + $0xd8] sm:$0xf0]  ;;  %v682_v53 = vld [vmem:[#allocation6 + $0x2] sm:$0x3]  ;;  %v1892_v54 = vld [vmem:[#allocation9 + $0x1cc] sm:$0xf]  ;;  %v1552_v60 = vor.u32 %v1894_v50, %v1551_v48 }
  0x35   :  { %529 = vmatpush.bf16.msra.mxu1 %v1464_v24  ;;  %542 = vmatpush.bf16.msra.mxu2 %v1340_v25  ;;  %v1553_v55 = vld [vmem:[#allocation9 + $0x1d8] sm:$0xf0]  ;;  %v1407_v58 = vld [vmem:[#allocation9 + $0xa8] sm:$0xf]  ;;  %v1858_v59 = vld [vmem:[#allocation9 + $0xb4] sm:$0xf0]  ;;  %v1428_v61 = vor.u32 %v1860_v51, %v1425_v52 }
  0x36   :  { %555 = vmatpush.bf16.msra.mxu3 %v1468_v29  ;;  %v1535_v62 = vld [vmem:[#allocation9 + $0x1a8] sm:$0xf]  ;;  %v1890_v63 = vld [vmem:[#allocation9 + $0x1b4] sm:$0xf0]  ;;  %v1556_v0 = vor.u32 %v1892_v54, %v1553_v55  ;;  %v1856_v1 = vld [vmem:[#allocation9 + $0xac] sm:$0xf]  ;;  %v1408_v5 = vor.u32 %v1858_v59, %v1407_v58 }
  0x37   :  { %v171_v56 = vld [vmem:[#allocation2] sm:$0xf]  ;;  %v1409_v2 = vld [vmem:[#allocation9 + $0xb8] sm:$0xf0]  ;;  %v1888_v3 = vld [vmem:[#allocation9 + $0x1ac] sm:$0xf]  ;;  %v1536_v6 = vor.u32 %v1890_v63, %v1535_v62 }
  0x38   :  { %517 = vmatpush.bf16.msra.mxu0 %v1320_v34  ;;  %173 = vst [vmem:[#allocation1] ss:$4 sm:$0xff] %v171_v56  ;;  %v1537_v4 = vld [vmem:[#allocation9 + $0x1b8] sm:$0xf0]  ;;  %v1412_v7 = vor.u32 %v1856_v1, %v1409_v2  ;;  %v1391_v8 = vld [vmem:[#allocation9 + $0x88] sm:$0xf] }
  0x39   :  { %530 = vmatpush.bf16.msra.mxu1 %v1448_v38  ;;  %543 = vmatpush.bf16.msra.mxu2 %v1324_v39  ;;  %683 = vst [vmem:[#allocation2 + $0x2] sm:$0x3] %v682_v53  ;;  %v1854_v9 = vld [vmem:[#allocation9 + $0x94] sm:$0xf0]  ;;  %v1540_v10 = vor.u32 %v1888_v3, %v1537_v4  ;;  %v1519_v11 = vld [vmem:[#allocation9 + $0x188] sm:$0xf] }
  0x3a   :  { %556 = vmatpush.bf16.msra.mxu3 %v1452_v42  ;;  %v1886_v12 = vld [vmem:[#allocation9 + $0x194] sm:$0xf0]  ;;  %v1852_v13 = vld [vmem:[#allocation9 + $0x8c] sm:$0xf]  ;;  %v1393_v14 = vld [vmem:[#allocation9 + $0x98] sm:$0xf0]  ;;  %v1392_v19 = vor.u32 %v1854_v9, %v1391_v8 }
  0x3b   :  { %v1884_v15 = vld [vmem:[#allocation9 + $0x18c] sm:$0xf]  ;;  %v1521_v16 = vld [vmem:[#allocation9 + $0x198] sm:$0xf0]  ;;  %v1520_v22 = vor.u32 %v1886_v12, %v1519_v11  ;;  %v1375_v23 = vld [vmem:[#allocation9 + $0x68] sm:$0xf]  ;;  %v1396_v25 = vor.u32 %v1852_v13, %v1393_v14 }
  0x3c   :  { %562 = vmatpush.bf16.msrb.mxu0 %v1440_v43  ;;  %v1850_v24 = vld [vmem:[#allocation9 + $0x74] sm:$0xf0]  ;;  %v1524_v26 = vor.u32 %v1884_v15, %v1521_v16  ;;  %v1503_v27 = vld [vmem:[#allocation9 + $0x168] sm:$0xf]  ;;  %v1848_v29 = vld [vmem:[#allocation9 + $0x6c] sm:$0xf] }
  0x3d   :  { %575 = vmatpush.bf16.msrb.mxu1 %v1568_v44  ;;  %588 = vmatpush.bf16.msrb.mxu2 %v1444_v45  ;;  %v1882_v28 = vld [vmem:[#allocation9 + $0x174] sm:$0xf0]  ;;  %v1377_v30 = vld [vmem:[#allocation9 + $0x78] sm:$0xf0]  ;;  %v1880_v31 = vld [vmem:[#allocation9 + $0x16c] sm:$0xf]  ;;  %v1376_v33 = vor.u32 %v1850_v24, %v1375_v23 }
  0x3e   :  { %601 = vmatpush.bf16.msrb.mxu3 %v1572_v49  ;;  %v1505_v32 = vld [vmem:[#allocation9 + $0x178] sm:$0xf0]  ;;  %v1504_v34 = vor.u32 %v1882_v28, %v1503_v27  ;;  %v1359_v35 = vld [vmem:[#allocation9 + $0x48] sm:$0xf]  ;;  %v1846_v36 = vld [vmem:[#allocation9 + $0x54] sm:$0xf0]  ;;  %v1380_v37 = vor.u32 %v1848_v29, %v1377_v30 }
  0x3f   :  { %v174_v17 = vld.sshfl [vmem:[#allocation1] sm:$0xff pattern:$0x73625140]  ;;  %v175_v18 = vld.sshfl [vmem:[#allocation1 + $0x8] sm:$0xff pattern:$0x73625140]  ;;  %v1508_v38 = vor.u32 %v1880_v31, %v1505_v32  ;;  %v1360_v45 = vor.u32 %v1846_v36, %v1359_v35 }
  0x40   :  { %563 = vmatpush.bf16.msrb.mxu0 %v1424_v57  ;;  %v2289_v20 = vpack.c.bf16 %v174_v17, %v174_v17  ;;  %v2291_v21 = vpack.c.bf16 %v175_v18, %v175_v18  ;;  %v1487_v39 = vld [vmem:[#allocation9 + $0x148] sm:$0xf]  ;;  %v1878_v40 = vld [vmem:[#allocation9 + $0x154] sm:$0xf0]  ;;  %v1844_v41 = vld [vmem:[#allocation9 + $0x4c] sm:$0xf] }
  0x41   :  { %576 = vmatpush.bf16.msrb.mxu1 %v1552_v60  ;;  %589 = vmatpush.bf16.msrb.mxu2 %v1428_v61  ;;  %v1361_v42 = vld [vmem:[#allocation9 + $0x58] sm:$0xf0]  ;;  %v1876_v43 = vld [vmem:[#allocation9 + $0x14c] sm:$0xf]  ;;  %v1488_v46 = vor.u32 %v1878_v40, %v1487_v39  ;;  %v1343_v47 = vld [vmem:[#allocation9 + $0x28] sm:$0xf] }
  0x42   :  { %602 = vmatpush.bf16.msrb.mxu3 %v1556_v0  ;;  %518 = vmatmul.bf16.vlgmr.msra.gmra.mxu0 %v2289_v20  ;;  %v1489_v44 = vld [vmem:[#allocation9 + $0x158] sm:$0xf0]  ;;  %v1842_v48 = vld [vmem:[#allocation9 + $0x34] sm:$0xf0]  ;;  %v1364_v49 = vor.u32 %v1844_v41, %v1361_v42  ;;  %v1471_v51 = vld [vmem:[#allocation9 + $0x128] sm:$0xf] }
  0x43   :  { %544 = vmatmul.bf16.vlgmr.msra.gmra.mxu2 %v2289_v20  ;;  %531 = vmatmul.bf16.vlgmr.msra.gmra.mxu1 %v2291_v21  ;;  %v1492_v50 = vor.u32 %v1876_v43, %v1489_v44  ;;  %v1874_v52 = vld [vmem:[#allocation9 + $0x134] sm:$0xf0]  ;;  %v1840_v53 = vld [vmem:[#allocation9 + $0x2c] sm:$0xf]  ;;  %v1345_v54 = vld [vmem:[#allocation9 + $0x38] sm:$0xf0]  ;;  %v1344_v57 = vor.u32 %v1842_v48, %v1343_v47 }
  0x44   :  { %564 = vmatpush.bf16.msrb.mxu0 %v1408_v5  ;;  %557 = vmatmul.bf16.vlgmr.msra.gmra.mxu3 %v2291_v21  ;;  %v1872_v55 = vld [vmem:[#allocation9 + $0x12c] sm:$0xf]  ;;  %v1473_v56 = vld [vmem:[#allocation9 + $0x138] sm:$0xf0]  ;;  %v1472_v58 = vor.u32 %v1874_v52, %v1471_v51  ;;  %v1327_v59 = vld [vmem:[#allocation9 + $0x8] sm:$0xf]  ;;  %v1348_v61 = vor.u32 %v1840_v53, %v1345_v54 }
  0x45   :  { %577 = vmatpush.bf16.msrb.mxu1 %v1536_v6  ;;  %590 = vmatpush.bf16.msrb.mxu2 %v1412_v7  ;;  %v1838_v60 = vld [vmem:[#allocation9 + $0x14] sm:$0xf0]  ;;  %v1476_v62 = vor.u32 %v1872_v55, %v1473_v56  ;;  %v1455_v63 = vld [vmem:[#allocation9 + $0x108] sm:$0xf]  ;;  %v1836_v1 = vld [vmem:[#allocation9 + $0xc] sm:$0xf] }
  0x46   :  { %603 = vmatpush.bf16.msrb.mxu3 %v1540_v10  ;;  %v1870_v0 = vld [vmem:[#allocation9 + $0x114] sm:$0xf0]  ;;  %v1329_v2 = vld [vmem:[#allocation9 + $0x18] sm:$0xf0]  ;;  %v1868_v3 = vld [vmem:[#allocation9 + $0x10c] sm:$0xf]  ;;  %v1328_v5 = vor.u32 %v1838_v60, %v1327_v59 }
  0x47   :  { %v1457_v4 = vld [vmem:[#allocation9 + $0x118] sm:$0xf0]  ;;  %v1456_v6 = vor.u32 %v1870_v0, %v1455_v63  ;;  %v1332_v7 = vor.u32 %v1836_v1, %v1329_v2  ;;  %v2301_v9 = vld [vmem:[#allocation11] sm:$0xf]  ;;  %v1929_v17 = vld [vmem:[#allocation9 + $0x2ec] sm:$0xf0] }
  0x48   :  { %565 = vmatpush.bf16.msrb.mxu0 %v1392_v19  ;;  %v1460_v8 = vor.u32 %v1868_v3, %v1457_v4  ;;  %v182_v10 = vperm.slane %v2301_v9, 0  ;;  %v183_v15 = vperm.slane %v2301_v9, 1  ;;  %v1690_v16 = vld [vmem:[#allocation9 + $0x2e0] sm:$0xf]  ;;  %v1961_v23 = vld [vmem:[#allocation9 + $0x3ec] sm:$0xf0] }
  0x49   :  { %578 = vmatpush.bf16.msrb.mxu1 %v1520_v22  ;;  %591 = vmatpush.bf16.msrb.mxu2 %v1396_v25  ;;  %v1818_v18 = vld [vmem:[#allocation9 + $0x3e0] sm:$0xf]  ;;  %v1691_v22 = vor.u32 %v1929_v17, %v1690_v16  ;;  %v1927_v24 = vld [vmem:[#allocation9 + $0x2e4] sm:$0xf]  ;;  %v1820_v27 = vld [vmem:[#allocation9 + $0x3f0] sm:$0xf0] }
  0x4a   :  { %604 = vmatpush.bf16.msrb.mxu3 %v1524_v26  ;;  %v1819_v25 = vor.u32 %v1961_v23, %v1818_v18  ;;  %v1959_v26 = vld [vmem:[#allocation9 + $0x3e4] sm:$0xf]  ;;  %v1802_v35 = vld [vmem:[#allocation9 + $0x3c0] sm:$0xf]  ;;  %v1957_v39 = vld [vmem:[#allocation9 + $0x3cc] sm:$0xf0] }
  0x4b   :  { %v1823_v31 = vor.u32 %v1959_v26, %v1820_v27  ;;  %v1923_v40 = vld [vmem:[#allocation9 + $0x2c4] sm:$0xf]  ;;  %v1676_v41 = vld [vmem:[#allocation9 + $0x2d0] sm:$0xf0]  ;;  %v1803_v42 = vor.u32 %v1957_v39, %v1802_v35  ;;  %v1658_v48 = vld [vmem:[#allocation9 + $0x2a0] sm:$0xf] }
  0x4c   :  { %566 = vmatpush.bf16.msrb.mxu0 %v1376_v33  ;;  %v1674_v33 = vld [vmem:[#allocation9 + $0x2c0] sm:$0xf]  ;;  %v1679_v43 = vor.u32 %v1923_v40, %v1676_v41  ;;  %v1955_v44 = vld [vmem:[#allocation9 + $0x3c4] sm:$0xf]  ;;  %v1953_v53 = vld [vmem:[#allocation9 + $0x3ac] sm:$0xf0] }
  0x4d   :  { %579 = vmatpush.bf16.msrb.mxu1 %v1504_v34  ;;  %592 = vmatpush.bf16.msrb.mxu2 %v1380_v37  ;;  %v1925_v34 = vld [vmem:[#allocation9 + $0x2cc] sm:$0xf0]  ;;  %v1919_v54 = vld [vmem:[#allocation9 + $0x2a4] sm:$0xf]  ;;  %v1660_v55 = vld [vmem:[#allocation9 + $0x2b0] sm:$0xf0] }
  0x4e   :  { %605 = vmatpush.bf16.msrb.mxu3 %v1508_v38  ;;  %v1675_v38 = vor.u32 %v1925_v34, %v1674_v33  ;;  %v1663_v59 = vor.u32 %v1919_v54, %v1660_v55  ;;  %v1951_v60 = vld [vmem:[#allocation9 + $0x3a4] sm:$0xf]  ;;  %v1642_v0 = vld [vmem:[#allocation9 + $0x280] sm:$0xf]  ;;  %v1917_v1 = vld [vmem:[#allocation9 + $0x28c] sm:$0xf0] }
  0x4f   :  { %v1770_v2 = vld [vmem:[#allocation9 + $0x380] sm:$0xf]  ;;  %v1949_v3 = vld [vmem:[#allocation9 + $0x38c] sm:$0xf0]  ;;  %v184_v4 = vperm.slane %v2301_v9, 2  ;;  %v185_v27 = vperm.slane %v2301_v9, 3 }
  0x50   :  { %567 = vmatpush.bf16.msrb.mxu0 %v1360_v45  ;;  %v1804_v45 = vld [vmem:[#allocation9 + $0x3d0] sm:$0xf0]  ;;  %v1626_v17 = vld [vmem:[#allocation9 + $0x260] sm:$0xf]  ;;  %v1913_v18 = vld [vmem:[#allocation9 + $0x26c] sm:$0xf0] }
  0x51   :  { %580 = vmatpush.bf16.msrb.mxu1 %v1488_v46  ;;  %593 = vmatpush.bf16.msrb.mxu2 %v1364_v49  ;;  %v1807_v47 = vor.u32 %v1955_v44, %v1804_v45  ;;  %v1921_v49 = vld [vmem:[#allocation9 + $0x2ac] sm:$0xf0]  ;;  %v1627_v23 = vor.u32 %v1913_v18, %v1626_v17  ;;  %v1756_v34 = vld [vmem:[#allocation9 + $0x370] sm:$0xf0]  ;;  %v1610_v39 = vld [vmem:[#allocation9 + $0x240] sm:$0xf] }
  0x52   :  { %606 = vmatpush.bf16.msrb.mxu3 %v1492_v50  ;;  %v1786_v50 = vld [vmem:[#allocation9 + $0x3a0] sm:$0xf]  ;;  %v1659_v52 = vor.u32 %v1921_v49, %v1658_v48  ;;  %v1909_v9 = vld [vmem:[#allocation9 + $0x24c] sm:$0xf0]  ;;  %v1612_v48 = vld [vmem:[#allocation9 + $0x250] sm:$0xf0] }
  0x53   :  { %v1941_v44 = vld [vmem:[#allocation9 + $0x34c] sm:$0xf0]  ;;  %s2224_s2 = smov [#allocation13]   ;;  %s1280_s8 = sshll.u32 %s2408_s6, 4  ;;  %s1281_s8 = int_to_ptr.hbm [resolvable:$true] %s1280_s8 }
  0x54   :  { %568 = vmatpush.bf16.msrb.mxu0 %v1344_v57  ;;  %s1278_s4 = sshll.u32 %s2224_s2, 4  ;;  %s2225_s11 = smov [#allocation12]   ;;  %s1279_s4 = int_to_ptr.vmem [resolvable:$true] %s1278_s4 }
  0x55   :  { %581 = vmatpush.bf16.msrb.mxu1 %v1472_v58  ;;  %594 = vmatpush.bf16.msrb.mxu2 %v1348_v61  ;;  %v1787_v58 = vor.u32 %v1953_v53, %v1786_v50  ;;  %v1788_v61 = vld [vmem:[#allocation9 + $0x3b0] sm:$0xf0]  ;;  %v1939_v50 = vld [vmem:[#allocation9 + $0x344] sm:$0xf]  ;;  %s1268_s12 = sshll.u32 %s2225_s11, 4  ;;  %s1270_s14 = sshll.u32 %s2407_s5, 4  ;;  %s1269_s12 = int_to_ptr.vmem [resolvable:$true] %s1268_s12  ;;  %s1271_s14 = int_to_ptr.hbm [resolvable:$true] %s1270_s14 }
  0x56   :  { %607 = vmatpush.bf16.msrb.mxu3 %v1476_v62  ;;  %v1791_v63 = vor.u32 %v1951_v60, %v1788_v61  ;;  %v1905_v60 = vld [vmem:[#allocation9 + $0x22c] sm:$0xf0]  ;;  %v1722_v61 = vld [vmem:[#allocation9 + $0x320] sm:$0xf]  ;;  %s2226_s15 = smov [#allocation15]   ;;  %s1293_s18 = sshll.u32 %s2409_s7, 4  ;;  %s1294_s18 = int_to_ptr.hbm [resolvable:$true] %s1293_s18 }
  0x57   :  { %s1291_s16 = sshll.u32 %s2226_s15, 4  ;;  %s1292_s16 = int_to_ptr.vmem [resolvable:$true] %s1291_s16 }
  0x58   :  { %569 = vmatpush.bf16.msrb.mxu0 %v1328_v5  ;;  %v1643_v5 = vor.u32 %v1917_v1, %v1642_v0 }
  0x59   :  { %582 = vmatpush.bf16.msrb.mxu1 %v1456_v6  ;;  %595 = vmatpush.bf16.msrb.mxu2 %v1332_v7  ;;  %v1771_v6 = vor.u32 %v1949_v3, %v1770_v2  ;;  %v1915_v7 = vld [vmem:[#allocation9 + $0x284] sm:$0xf] }
  0x5a   :  { %608 = vmatpush.bf16.msrb.mxu3 %v1460_v8  ;;  %v1644_v8 = vld [vmem:[#allocation9 + $0x290] sm:$0xf0]  ;;  %v1903_v3 = vld [vmem:[#allocation9 + $0x224] sm:$0xf] }
  0x5b   :  { %570 = vmatmul.bf16.vlgmr.msrb.gmra.mxu0 %v2289_v20 }
  0x5c   :  { %583 = vmatmul.bf16.vlgmr.msrb.gmra.mxu1 %v2291_v21  ;;  %596 = vmatmul.bf16.vlgmr.msrb.gmra.mxu2 %v2289_v20 }
  0x5d   :  { %609 = vmatmul.bf16.vlgmr.msrb.gmra.mxu3 %v2291_v21  ;;  %v1692_v21 = vld [vmem:[#allocation9 + $0x2f0] sm:$0xf0]  ;;  %1089 = vmatpush.bf16.msra.mxu0 %v1691_v22 }
  0x5e   :  { %v1695_v30 = vor.u32 %v1927_v24, %v1692_v21  ;;  %1102 = vmatpush.bf16.msra.mxu1 %v1819_v25  ;;  %1128 = vmatpush.bf16.msra.mxu3 %v1823_v31  ;;  %v1754_v24 = vld [vmem:[#allocation9 + $0x360] sm:$0xf]  ;;  %v1911_v25 = vld [vmem:[#allocation9 + $0x264] sm:$0xf] }
  0x60   :  { %1115 = vmatpush.bf16.msra.mxu2 %v1695_v30 }
  0x61   :  { %1090 = vmatpush.bf16.msra.mxu0 %v1675_v38 }
  0x62   :  { %1103 = vmatpush.bf16.msra.mxu1 %v1803_v42  ;;  %1129 = vmatpush.bf16.msra.mxu3 %v1807_v47  ;;  %v1611_v42 = vor.u32 %v1909_v9, %v1610_v39  ;;  %v1907_v47 = vld [vmem:[#allocation9 + $0x244] sm:$0xf] }
  0x63   :  { %v1615_v49 = vor.u32 %v1907_v47, %v1612_v48  ;;  %v1960_v47 = vld [vmem:[#allocation9 + $0x3ec] sm:$0xf]  ;;  %v1828_v48 = vld [vmem:[#allocation9 + $0x3f8] sm:$0xf0] }
  0x64   :  { %1116 = vmatpush.bf16.msra.mxu2 %v1679_v43  ;;  %v1738_v43 = vld [vmem:[#allocation9 + $0x340] sm:$0xf] }
  0x65   :  { %1091 = vmatpush.bf16.msra.mxu0 %v1659_v52  ;;  %v1594_v52 = vld [vmem:[#allocation9 + $0x220] sm:$0xf] }
  0x66   :  { %1104 = vmatpush.bf16.msra.mxu1 %v1787_v58  ;;  %1130 = vmatpush.bf16.msra.mxu3 %v1791_v63 }
  0x68   :  { %1117 = vmatpush.bf16.msra.mxu2 %v1663_v59 }
  0x69   :  { %1092 = vmatpush.bf16.msra.mxu0 %v1643_v5  ;;  %v1935_v5 = vld [vmem:[#allocation9 + $0x324] sm:$0xf] }
  0x6a   :  { %1105 = vmatpush.bf16.msra.mxu1 %v1771_v6 }
  0x6d   :  { %1093 = vmatpush.bf16.msra.mxu0 %v1627_v23 }
  0x71   :  { %1094 = vmatpush.bf16.msra.mxu0 %v1611_v42  ;;  %v1928_v42 = vld [vmem:[#allocation9 + $0x2ec] sm:$0xf] }
  0xbf   :  { %v519_v11 = vpop.f32.mrf.mxu0 }
  0xc0   :  { %v520_v12 = vadd.f32 %v519_v11, %v182_v10  ;;  %v532_v13 = vpop.f32.mrf.mxu1 }
  0xc2   :  { %v533_v14 = vadd.f32 %v532_v13, %v520_v12  ;;  %v1647_v12 = vor.u32 %v1915_v7, %v1644_v8  ;;  %v1947_v13 = vld [vmem:[#allocation9 + $0x384] sm:$0xf]  ;;  %v1595_v7 = vor.u32 %v1905_v60, %v1594_v52 }
  0xc4   :  { %v1573_v19 = vmul.f32 -1.442695, %v533_v14  ;;  %v1772_v14 = vld [vmem:[#allocation9 + $0x390] sm:$0xf0]  ;;  %1118 = vmatpush.bf16.msra.mxu2 %v1647_v12  ;;  %v1578_v12 = vld [vmem:[#allocation9 + $0x200] sm:$0xf]  ;;  %1095 = vmatpush.bf16.msra.mxu0 %v1595_v7 }
  0xc5   :  { %v1775_v16 = vor.u32 %v1947_v13, %v1772_v14  ;;  %v1922_v7 = vld [vmem:[#allocation9 + $0x2b4] sm:$0xf0] }
  0xc6   :  { %v545_v20 = vpop.f32.mrf.mxu2  ;;  %1978 = vpow2.f32 %v1573_v19 }
  0xc7   :  { %v546_v28 = vadd.f32 %v545_v20, %v183_v15  ;;  %v558_v29 = vpop.f32.mrf.mxu3  ;;  %v521_v32 = vpop.f32.mrf.mxu0  ;;  %v1945_v20 = vld [vmem:[#allocation9 + $0x36c] sm:$0xf0]  ;;  %1131 = vmatpush.bf16.msra.mxu3 %v1775_v16 }
  0xc8   :  { %v534_v37 = vpop.f32.mrf.mxu1  ;;  %v1755_v33 = vor.u32 %v1945_v20, %v1754_v24  ;;  %v1899_v20 = vld [vmem:[#allocation9 + $0x204] sm:$0xf] }
  0xc9   :  { %v559_v36 = vadd.f32 %v558_v29, %v546_v28  ;;  %v1628_v28 = vld [vmem:[#allocation9 + $0x270] sm:$0xf0]  ;;  %v1943_v29 = vld [vmem:[#allocation9 + $0x364] sm:$0xf] }
  0xca   :  { %v1631_v37 = vor.u32 %v1911_v25, %v1628_v28  ;;  %v1759_v38 = vor.u32 %v1943_v29, %v1756_v34  ;;  %1106 = vmatpush.bf16.msra.mxu1 %v1755_v33  ;;  %v1580_v25 = vld [vmem:[#allocation9 + $0x210] sm:$0xf0]  ;;  %v1931_v28 = vld [vmem:[#allocation9 + $0x304] sm:$0xf] }
  0xcb   :  { %v1574_v46 = vmul.f32 -1.442695, %v559_v36  ;;  %v1708_v29 = vld [vmem:[#allocation9 + $0x310] sm:$0xf0]  ;;  %v1583_v33 = vor.u32 %v1899_v20, %v1580_v25  ;;  %v1950_v20 = vld [vmem:[#allocation9 + $0x394] sm:$0xf0] }
  0xcc   :  { %v1979_v51 = vpop.eup %1978  ;;  %1119 = vmatpush.bf16.msra.mxu2 %v1631_v37  ;;  %1132 = vmatpush.bf16.msra.mxu3 %v1759_v38  ;;  %v1711_v34 = vor.u32 %v1931_v28, %v1708_v29  ;;  %v1962_v37 = vld [vmem:[#allocation9 + $0x3f4] sm:$0xf0]  ;;  %v1916_v25 = vld [vmem:[#allocation9 + $0x28c] sm:$0xf]  ;;  %v1652_v28 = vld [vmem:[#allocation9 + $0x298] sm:$0xf0] }
  0xcd   :  { %1980 = vpow2.f32 %v1574_v46  ;;  %v2305_v56 = vadd.f32 1.0, %v1979_v51  ;;  %v1739_v46 = vor.u32 %v1941_v44, %v1738_v43  ;;  %v1740_v51 = vld [vmem:[#allocation9 + $0x350] sm:$0xf0]  ;;  %v1700_v43 = vld [vmem:[#allocation9 + $0x2f8] sm:$0xf0] }
  0xce   :  { %v547_v57 = vpop.f32.mrf.mxu2  ;;  %v1743_v59 = vor.u32 %v1939_v50, %v1740_v51  ;;  %v672_v50 = vld [vmem:[#allocation8] sm:$0x3]  ;;  %v1926_v51 = vld [vmem:[#allocation9 + $0x2d4] sm:$0xf0]  ;;  %v1948_v29 = vld [vmem:[#allocation9 + $0x38c] sm:$0xf] }
  0xcf   :  { %v560_v62 = vpop.f32.mrf.mxu3  ;;  %1982 = vrcp.f32 %v2305_v56  ;;  %v637_v11 = vand.u32 2147483648, %v2305_v56  ;;  %v635_v31 = vand.u32 2147483647, %v2305_v56  ;;  %vm631_vm1 = vweird.f32 %v2305_v56  ;;  %1107 = vmatpush.bf16.msra.mxu1 %v1739_v46  ;;  %v1762_v38 = vld [vmem:[#allocation9 + $0x368] sm:$0xf] }
  0xd0   :  { %v1937_v62 = vld [vmem:[#allocation9 + $0x32c] sm:$0xf0]  ;;  %1120 = vmatpush.bf16.msra.mxu2 %v1615_v49  ;;  %1133 = vmatpush.bf16.msra.mxu3 %v1743_v59  ;;  %v1682_v49 = vld [vmem:[#allocation9 + $0x2c8] sm:$0xf]  ;;  %v1924_v59 = vld [vmem:[#allocation9 + $0x2cc] sm:$0xf] }
  0xd1   :  { %v2319_v32 = vor.u32 1.1754944e-38, %v637_v11  ;;  %vm2328_vm3 = vcmp.eq.f32.partialorder %v635_v31, 8.507059e+37  ;;  %v1723_v8 = vor.u32 %v1937_v62, %v1722_v61  ;;  %v1724_v11 = vld [vmem:[#allocation9 + $0x330] sm:$0xf0] }
  0xd2   :  { %v1727_v18 = vor.u32 %v1935_v5, %v1724_v11  ;;  %v1666_v5 = vld [vmem:[#allocation9 + $0x2a8] sm:$0xf]  ;;  %v1920_v11 = vld [vmem:[#allocation9 + $0x2ac] sm:$0xf] }
  0xd3   :  { %v1981_v10 = vpop.eup %1980  ;;  %1108 = vmatpush.bf16.msra.mxu1 %v1723_v8  ;;  %v1667_v58 = vor.u32 %v1922_v7, %v1666_v5  ;;  %v1730_v5 = vld [vmem:[#allocation9 + $0x328] sm:$0xf]  ;;  %v1938_v7 = vld [vmem:[#allocation9 + $0x334] sm:$0xf0] }
  0xd4   :  { %v2310_v15 = vadd.f32 1.0, %v1981_v10  ;;  %1134 = vmatpush.bf16.msra.mxu3 %v1727_v18 }
  0xd5   :  { %v2312_v21 = vpop.eup %1982 }
  0xd6   :  { %1984 = vrcp.f32 %v2310_v15  ;;  %v627_v30 = vmul.f32 %v2312_v21, %v2305_v56  ;;  %v650_v36 = vand.u32 2147483647, %v2310_v15  ;;  %v652_v41 = vand.u32 2147483648, %v2310_v15  ;;  %v1933_v56 = vld [vmem:[#allocation9 + $0x30c] sm:$0xf0] }
  0xd7   :  { %vm632_vm2 = vweird.f32 %v2312_v21  ;;  %vm646_vm6 = vweird.f32 %v2310_v15 }
  0xd8   :  { %v571_v19 = vpop.f32.mrf.mxu0  ;;  %v628_v40 = vsub.f32 1.0, %v627_v30  ;;  %v2334_v6 = vor.u32 1.1754944e-38, %v652_v41  ;;  %vm2340_vm4 = vmor %vm631_vm1, %vm632_vm2  ;;  %vm2344_vm5 = vcmp.eq.f32.partialorder %v650_v36, 8.507059e+37  ;;  %v1698_v30 = vld [vmem:[#allocation9 + $0x2e8] sm:$0xf]  ;;  %1135 = vmatpush.bf16.msra.mxu3 %v1711_v34 }
  0xd9   :  { %v584_v22 = vpop.f32.mrf.mxu1  ;;  %v572_v26 = vadd.f32 %v571_v19, %v184_v4  ;;  %v1596_v4 = vld [vmem:[#allocation9 + $0x230] sm:$0xf0]  ;;  %v1901_v19 = vld [vmem:[#allocation9 + $0x20c] sm:$0xf0]  ;;  %v1826_v36 = vld [vmem:[#allocation9 + $0x3e8] sm:$0xf] }
  0xda   :  { %v629_v57 = vmul.f32 %v2312_v21, %v628_v40  ;;  %v1599_v10 = vor.u32 %v1903_v3, %v1596_v4  ;;  %v1579_v24 = vor.u32 %v1901_v19, %v1578_v12  ;;  %v1827_v41 = vor.u32 %v1962_v37, %v1826_v36  ;;  %v1812_v4 = vld [vmem:[#allocation9 + $0x3d8] sm:$0xf0]  ;;  %v1650_v19 = vld [vmem:[#allocation9 + $0x288] sm:$0xf]  ;;  %v1914_v37 = vld [vmem:[#allocation9 + $0x274] sm:$0xf0] }
  0xdb   :  { %v585_v35 = vadd.f32 %v584_v22, %v572_v26  ;;  %v1706_v22 = vld [vmem:[#allocation9 + $0x300] sm:$0xf]  ;;  %v1655_v36 = vor.u32 %v1916_v25, %v1652_v28 }
  0xdc   :  { %v2324_v53 = vpop.eup %1984  ;;  %v630_v23 = vadd.f32 %v2312_v21, %v629_v57  ;;  %1121 = vmatpush.bf16.msra.mxu2 %v1599_v10  ;;  %1096 = vmatpush.bf16.msra.mxu0 %v1579_v24  ;;  %v1958_v57 = vld [vmem:[#allocation9 + $0x3d4] sm:$0xf0] }
  0xdd   :  { %v1575_v45 = vmul.f32 -1.442695, %v585_v35  ;;  %v642_v63 = vmul.f32 %v2324_v53, %v2310_v15  ;;  %vm647_vm7 = vweird.f32 %v2324_v53  ;;  %v1930_v35 = vld [vmem:[#allocation9 + $0x2f4] sm:$0xf0]  ;;  %v1703_v15 = vor.u32 %v1928_v42, %v1700_v43  ;;  %v1912_v42 = vld [vmem:[#allocation9 + $0x26c] sm:$0xf] }
  0xde   :  { %vm2356_vm8 = vmor %vm646_vm6, %vm647_vm7  ;;  %v1699_v40 = vor.u32 %v1930_v35, %v1698_v30  ;;  %v634_v44 = vsel %vm2340_vm4, %v2312_v21, %v630_v23  ;;  %v1831_v21 = vor.u32 %v1960_v47, %v1828_v48  ;;  %v1954_v10 = vld [vmem:[#allocation9 + $0x3b4] sm:$0xf0]  ;;  %v1778_v23 = vld [vmem:[#allocation9 + $0x388] sm:$0xf] }
  0xdf   :  { %1986 = vpow2.f32 %v1575_v45  ;;  %v597_v54 = vpop.f32.mrf.mxu2  ;;  %v643_v13 = vsub.f32 1.0, %v642_v63  ;;  %v639_v61 = vsel %vm2328_vm3, %v2319_v32, %v634_v44  ;;  %v1794_v32 = vld [vmem:[#allocation9 + $0x3a8] sm:$0xf]  ;;  %v1779_v35 = vor.u32 %v1950_v20, %v1778_v23  ;;  %v1636_v43 = vld [vmem:[#allocation9 + $0x278] sm:$0xf0] }
  0xe0   :  { %v610_v55 = vpop.f32.mrf.mxu3  ;;  %v598_v0 = vadd.f32 %v597_v54, %v185_v27  ;;  %v573_v1 = vpop.f32.mrf.mxu0  ;;  %v1707_v27 = vor.u32 %v1933_v56, %v1706_v22  ;;  %1141 = vmatpush.bf16.msrb.mxu0 %v1699_v40  ;;  %1122 = vmatpush.bf16.msra.mxu2 %v1583_v33  ;;  %v1683_v54 = vor.u32 %v1926_v51, %v1682_v49  ;;  %v1918_v22 = vld [vmem:[#allocation9 + $0x294] sm:$0xf0]  ;;  %v1634_v33 = vld [vmem:[#allocation9 + $0x268] sm:$0xf]  ;;  %v1588_v23 = vld [vmem:[#allocation9 + $0x218] sm:$0xf0] }
  0xe1   :  { %v586_v2 = vpop.f32.mrf.mxu1  ;;  %v644_v26 = vmul.f32 %v2324_v53, %v643_v13  ;;  %1180 = vmatpush.bf16.msrb.mxu3 %v1831_v21  ;;  %v1952_v13 = vld [vmem:[#allocation9 + $0x3ac] sm:$0xf]  ;;  %v1795_v17 = vor.u32 %v1954_v10, %v1794_v32  ;;  %v1635_v44 = vor.u32 %v1914_v37, %v1634_v33  ;;  %v1618_v47 = vld [vmem:[#allocation9 + $0x248] sm:$0xf]  ;;  %v1910_v48 = vld [vmem:[#allocation9 + $0x254] sm:$0xf0] }
  0xe2   :  { %v611_v14 = vadd.f32 %v610_v55, %v598_v0  ;;  %1109 = vmatpush.bf16.msra.mxu1 %v1707_v27  ;;  %v1810_v55 = vld [vmem:[#allocation9 + $0x3c8] sm:$0xf]  ;;  %v1956_v0 = vld [vmem:[#allocation9 + $0x3cc] sm:$0xf]  ;;  %v1651_v27 = vor.u32 %v1918_v22, %v1650_v19  ;;  %v1604_v32 = vld [vmem:[#allocation9 + $0x238] sm:$0xf0] }
  0xe3   :  { %v645_v9 = vadd.f32 %v2324_v53, %v644_v26  ;;  %v1811_v63 = vor.u32 %v1958_v57, %v1810_v55  ;;  %v1815_v8 = vor.u32 %v1956_v0, %v1812_v4  ;;  %v1746_v21 = vld [vmem:[#allocation9 + $0x348] sm:$0xf]  ;;  %v1942_v57 = vld [vmem:[#allocation9 + $0x354] sm:$0xf0]  ;;  %v1900_v22 = vld [vmem:[#allocation9 + $0x20c] sm:$0xf] }
  0xe4   :  { %1988 = vtanh.f32 %v611_v14  ;;  %1167 = vmatpush.bf16.msrb.mxu2 %v1703_v15  ;;  %1142 = vmatpush.bf16.msrb.mxu0 %v1683_v54  ;;  %v1796_v14 = vld [vmem:[#allocation9 + $0x3b8] sm:$0xf0]  ;;  %v1934_v19 = vld [vmem:[#allocation9 + $0x314] sm:$0xf0] }
  0xe5   :  { %v1987_v31 = vpop.eup %1986  ;;  %v649_v52 = vsel %vm2356_vm8, %v2324_v53, %v645_v9  ;;  %v1684_v53 = vld [vmem:[#allocation9 + $0x2d8] sm:$0xf0]  ;;  %1181 = vmatpush.bf16.msrb.mxu3 %v1815_v8  ;;  %v1799_v56 = vor.u32 %v1952_v13, %v1796_v14  ;;  %v1902_v13 = vld [vmem:[#allocation9 + $0x214] sm:$0xf0]  ;;  %v1731_v14 = vor.u32 %v1938_v7, %v1730_v5 }
  0xe6   :  { %v2360_v39 = vadd.f32 1.0, %v1987_v31  ;;  %v654_v62 = vsel %vm2344_vm5, %v2334_v6, %v649_v52  ;;  %1154 = vmatpush.bf16.msrb.mxu1 %v1827_v41  ;;  %v1687_v3 = vor.u32 %v1924_v59, %v1684_v53  ;;  %v1668_v6 = vld [vmem:[#allocation9 + $0x2b8] sm:$0xf0]  ;;  %v1946_v41 = vld [vmem:[#allocation9 + $0x374] sm:$0xf0]  ;;  %v1639_v52 = vor.u32 %v1912_v42, %v1636_v43 }
  0xe7   :  { %v599_v45 = vpop.f32.mrf.mxu2  ;;  %v673_v1 = vmul.f32 %v672_v50, %v654_v62  ;;  %v1671_v18 = vor.u32 %v1920_v11, %v1668_v6  ;;  %v1780_v31 = vld [vmem:[#allocation9 + $0x398] sm:$0xf0]  ;;  %v1763_v51 = vor.u32 %v1946_v41, %v1762_v38  ;;  %v1619_v62 = vor.u32 %v1910_v48, %v1618_v47  ;;  %v1936_v11 = vld [vmem:[#allocation9 + $0x32c] sm:$0xf]  ;;  %v1586_v6 = vld [vmem:[#allocation9 + $0x208] sm:$0xf] }
  0xe8   :  { %v612_v46 = vpop.f32.mrf.mxu3  ;;  %1990 = vrcp.f32 %v2360_v39  ;;  %1168 = vmatpush.bf16.msrb.mxu2 %v1687_v3  ;;  %v665_v26 = vand.u32 2147483647, %v2360_v39  ;;  %1143 = vmatpush.bf16.msrb.mxu0 %v1667_v58  ;;  %v667_v34 = vand.u32 2147483648, %v2360_v39  ;;  %v1783_v40 = vor.u32 %v1948_v29, %v1780_v31  ;;  %v1944_v45 = vld [vmem:[#allocation9 + $0x36c] sm:$0xf] }
  0xe9   :  { %1182 = vmatpush.bf16.msrb.mxu3 %v1799_v56  ;;  %v1764_v46 = vld [vmem:[#allocation9 + $0x378] sm:$0xf0]  ;;  %vm661_vm10 = vweird.f32 %v2360_v39  ;;  %v1747_v3 = vor.u32 %v1942_v57, %v1746_v21  ;;  %v1904_v58 = vld [vmem:[#allocation9 + $0x22c] sm:$0xf] }
  0xea   :  { %v1989_v60 = vpop.eup %1988  ;;  %1155 = vmatpush.bf16.msrb.mxu1 %v1811_v63  ;;  %vm666_vm12 = vcmp.eq.f32.partialorder %v665_v26, 8.507059e+37  ;;  %v668_v50 = vor.u32 1.1754944e-38, %v667_v34  ;;  %v1767_v55 = vor.u32 %v1944_v45, %v1764_v46  ;;  %v1620_v59 = vld [vmem:[#allocation9 + $0x258] sm:$0xf0]  ;;  %v1940_v63 = vld [vmem:[#allocation9 + $0x34c] sm:$0xf] }
  0xeb   :  { %v674_v2 = vmul.f32 %v1989_v60, %v639_v61  ;;  %v1748_v53 = vld [vmem:[#allocation9 + $0x358] sm:$0xf0]  ;;  %v1932_v56 = vld [vmem:[#allocation9 + $0x30c] sm:$0xf]  ;;  %v759_v34 = vld [vmem:[#allocation11 + $0x4] sm:$0xf] }
  0xec   :  { %1169 = vmatpush.bf16.msrb.mxu2 %v1671_v18  ;;  %1144 = vmatpush.bf16.msrb.mxu0 %v1651_v27  ;;  %v1751_v8 = vor.u32 %v1940_v63, %v1748_v53  ;;  %v1716_v20 = vld [vmem:[#allocation9 + $0x318] sm:$0xf0]  ;;  %v1591_v27 = vor.u32 %v1900_v22, %v1588_v23  ;;  %v763_v49 = vperm.slane %v759_v34, 2 }
  0xed   :  { %v675_v12 = vadd.f32 %v674_v2, %v673_v1  ;;  %1183 = vmatpush.bf16.msrb.mxu3 %v1783_v40  ;;  %v1602_v1 = vld [vmem:[#allocation9 + $0x228] sm:$0xf]  ;;  %v1906_v2 = vld [vmem:[#allocation9 + $0x234] sm:$0xf0]  ;;  %v1719_v28 = vor.u32 %v1932_v56, %v1716_v20  ;;  %v762_v40 = vperm.slane %v759_v34, 1 }
  0xee   :  { %v1991_v16 = vpop.eup %1990  ;;  %1156 = vmatpush.bf16.msrb.mxu1 %v1795_v17  ;;  %v1603_v10 = vor.u32 %v1906_v2, %v1602_v1  ;;  %v1714_v17 = vld [vmem:[#allocation9 + $0x308] sm:$0xf] }
  0xef   :  { %v657_v24 = vmul.f32 %v1991_v16, %v2360_v39  ;;  %679 = vst [vmem:[#allocation15] sm:$0x3] %v675_v12  ;;  %1992 = vtanh.f32 %v675_v12  ;;  %vm662_vm9 = vweird.f32 %v1991_v16  ;;  %v1908_v39 = vld [vmem:[#allocation9 + $0x24c] sm:$0xf]  ;;  %v1732_v12 = vld [vmem:[#allocation9 + $0x338] sm:$0xf0]  ;;  %v1715_v26 = vor.u32 %v1934_v19, %v1714_v17 }
  0xf0   :  { %vm2380_vm11 = vmor %vm661_vm10, %vm662_vm9  ;;  %1170 = vmatpush.bf16.msrb.mxu2 %v1655_v36  ;;  %1145 = vmatpush.bf16.msrb.mxu0 %v1635_v44  ;;  %v1623_v4 = vor.u32 %v1908_v39, %v1620_v59  ;;  %v1735_v18 = vor.u32 %v1936_v11, %v1732_v12  ;;  %v764_v59 = vperm.slane %v759_v34, 3 }
  0xf1   :  { %v658_v30 = vsub.f32 1.0, %v657_v24  ;;  %1184 = vmatpush.bf16.msrb.mxu3 %v1767_v55  ;;  %v1587_v24 = vor.u32 %v1902_v13, %v1586_v6 }
  0xf2   :  { %1157 = vmatpush.bf16.msrb.mxu1 %v1779_v35  ;;  %v761_v35 = vperm.slane %v759_v34, 0 }
  0xf3   :  { %v659_v9 = vmul.f32 %v1991_v16, %v658_v30 }
  0xf4   :  { %1171 = vmatpush.bf16.msrb.mxu2 %v1639_v52  ;;  %1146 = vmatpush.bf16.msrb.mxu0 %v1619_v62 }
  0xf5   :  { %v660_v15 = vadd.f32 %v1991_v16, %v659_v9  ;;  %v1993_v60 = vpop.eup %1992  ;;  %1185 = vmatpush.bf16.msrb.mxu3 %v1751_v8 }
  0xf6   :  { %1158 = vmatpush.bf16.msrb.mxu1 %v1763_v51 }
  0xf7   :  { %v664_v54 = vsel %vm2380_vm11, %v1991_v16, %v660_v15  ;;  %v1607_v16 = vor.u32 %v1904_v58, %v1604_v32 }
  0xf8   :  { %v669_v61 = vsel %vm666_vm12, %v668_v50, %v664_v54  ;;  %1172 = vmatpush.bf16.msrb.mxu2 %v1623_v4  ;;  %1147 = vmatpush.bf16.msrb.mxu0 %v1603_v10 }
  0xf9   :  { %v677_v0 = vmul.f32 %v1993_v60, %v669_v61  ;;  %1186 = vmatpush.bf16.msrb.mxu3 %v1735_v18 }
  0xfa   :  { %1159 = vmatpush.bf16.msrb.mxu1 %v1747_v3 }
  0xfb   :  { %680 = vst [vmem:[#allocation2] sm:$0x3] %v677_v0 }
  0xfc   :  { %678 = vst [vmem:[#allocation13] sm:$0x3] %v677_v0  ;;  %1173 = vmatpush.bf16.msrb.mxu2 %v1607_v16  ;;  %1148 = vmatpush.bf16.msrb.mxu0 %v1587_v24 }
  0xfd   :  { %1187 = vmatpush.bf16.msrb.mxu3 %v1719_v28 }
  0xfe   :  { %1160 = vmatpush.bf16.msrb.mxu1 %v1731_v14 }
 0x100   :  { %1174 = vmatpush.bf16.msrb.mxu2 %v1591_v27 }
 0x102   :  { %v749_v25 = vld [vmem:[#allocation2] sm:$0xf]  ;;  %1161 = vmatpush.bf16.msrb.mxu1 %v1715_v26  ;;  %v1252_v26 = vld [vmem:[#allocation8 + $0x2] sm:$0x3] }
 0x103   :  { %751 = vst [vmem:[#allocation1] ss:$4 sm:$0xff] %v749_v25 }
 0x10a   :  { %v752_v29 = vld.sshfl [vmem:[#allocation1] sm:$0xff pattern:$0x73625140]  ;;  %v753_v30 = vld.sshfl [vmem:[#allocation1 + $0x8] sm:$0xff pattern:$0x73625140] }
 0x10b   :  { %v756_v31 = vpack.c.bf16 %v752_v29, %v752_v29  ;;  %v757_v33 = vpack.c.bf16 %v753_v30, %v753_v30 }
 0x10d   :  { %1097 = vmatmul.bf16.vlgmr.msra.gmra.mxu0 %v756_v31  ;;  %1110 = vmatmul.bf16.vlgmr.msra.gmra.mxu1 %v757_v33 }
 0x10e   :  { %1123 = vmatmul.bf16.vlgmr.msra.gmra.mxu2 %v756_v31  ;;  %1136 = vmatmul.bf16.vlgmr.msra.gmra.mxu3 %v757_v33 }
 0x11d   :  { %1149 = vmatmul.bf16.vlgmr.msrb.gmra.mxu0 %v756_v31  ;;  %1162 = vmatmul.bf16.vlgmr.msrb.gmra.mxu1 %v757_v33 }
 0x11e   :  { %1175 = vmatmul.bf16.vlgmr.msrb.gmra.mxu2 %v756_v31  ;;  %1188 = vmatmul.bf16.vlgmr.msrb.gmra.mxu3 %v757_v33 }
 0x18a   :  { %v1098_v36 = vpop.f32.mrf.mxu0  ;;  %v1111_v37 = vpop.f32.mrf.mxu1 }
 0x18b   :  { %v1099_v38 = vadd.f32 %v1098_v36, %v761_v35 }
 0x18d   :  { %v1112_v9 = vadd.f32 %v1111_v37, %v1099_v38 }
 0x18f   :  { %v1832_v41 = vmul.f32 -1.442695, %v1112_v9 }
 0x191   :  { %1994 = vpow2.f32 %v1832_v41  ;;  %v1124_v42 = vpop.f32.mrf.mxu2  ;;  %v1137_v43 = vpop.f32.mrf.mxu3 }
 0x192   :  { %v1125_v44 = vadd.f32 %v1124_v42, %v762_v40  ;;  %v1100_v45 = vpop.f32.mrf.mxu0  ;;  %v1113_v46 = vpop.f32.mrf.mxu1 }
 0x194   :  { %v1138_v15 = vadd.f32 %v1137_v43, %v1125_v44 }
 0x196   :  { %v1833_v47 = vmul.f32 -1.442695, %v1138_v15 }
 0x197   :  { %v1995_v48 = vpop.eup %1994 }
 0x198   :  { %v1202_v50 = vadd.f32 1.0, %v1995_v48  ;;  %1996 = vpow2.f32 %v1833_v47 }
 0x199   :  { %v1126_v51 = vpop.f32.mrf.mxu2  ;;  %v1139_v52 = vpop.f32.mrf.mxu3 }
 0x19a   :  { %1998 = vrcp.f32 %v1202_v50  ;;  %v1150_v21 = vpop.f32.mrf.mxu0  ;;  %v1163_v54 = vpop.f32.mrf.mxu1  ;;  %v1216_v12 = vand.u32 2147483648, %v1202_v50  ;;  %vm1210_vm14 = vweird.f32 %v1202_v50  ;;  %v1214_v16 = vand.u32 2147483647, %v1202_v50 }
 0x19b   :  { %v1151_v55 = vadd.f32 %v1150_v21, %v763_v49 }
 0x19c   :  { %v1217_v23 = vor.u32 1.1754944e-38, %v1216_v12  ;;  %vm1215_vm3 = vcmp.eq.f32.partialorder %v1214_v16, 8.507059e+37 }
 0x19d   :  { %v1164_v57 = vadd.f32 %v1163_v54, %v1151_v55 }
 0x19e   :  { %v1997_v39 = vpop.eup %1996 }
 0x19f   :  { %v1203_v60 = vadd.f32 1.0, %v1997_v39  ;;  %v1834_v61 = vmul.f32 -1.442695, %v1164_v57 }
 0x1a0   :  { %v1999_v62 = vpop.eup %1998 }
 0x1a1   :  { %v1206_v63 = vmul.f32 %v1999_v62, %v1202_v50  ;;  %2000 = vrcp.f32 %v1203_v60  ;;  %v1176_v53 = vpop.f32.mrf.mxu2  ;;  %v1189_v0 = vpop.f32.mrf.mxu3  ;;  %vm1211_vm13 = vweird.f32 %v1999_v62  ;;  %v1231_v17 = vand.u32 2147483648, %v1203_v60 }
 0x1a2   :  { %2002 = vpow2.f32 %v1834_v61  ;;  %v1177_v1 = vadd.f32 %v1176_v53, %v764_v59  ;;  %v1152_v2 = vpop.f32.mrf.mxu0  ;;  %v1165_v3 = vpop.f32.mrf.mxu1  ;;  %vm1212_vm15 = vmor %vm1210_vm14, %vm1211_vm13  ;;  %v1229_v22 = vand.u32 2147483647, %v1203_v60  ;;  %vm1225_vm2 = vweird.f32 %v1203_v60 }
 0x1a3   :  { %v1207_v4 = vsub.f32 1.0, %v1206_v63  ;;  %v1232_v20 = vor.u32 1.1754944e-38, %v1231_v17 }
 0x1a4   :  { %v1190_v5 = vadd.f32 %v1189_v0, %v1177_v1  ;;  %vm1230_vm5 = vcmp.eq.f32.partialorder %v1229_v22, 8.507059e+37 }
 0x1a5   :  { %v1208_v7 = vmul.f32 %v1999_v62, %v1207_v4 }
 0x1a6   :  { %2004 = vtanh.f32 %v1190_v5 }
 0x1a7   :  { %v2001_v8 = vpop.eup %2000  ;;  %v1209_v10 = vadd.f32 %v1999_v62, %v1208_v7 }
 0x1a8   :  { %v2003_v58 = vpop.eup %2002  ;;  %v1221_v32 = vmul.f32 %v2001_v8, %v1203_v60  ;;  %vm1226_vm1 = vweird.f32 %v2001_v8 }
 0x1a9   :  { %v1204_v11 = vadd.f32 1.0, %v2003_v58  ;;  %v1178_v6 = vpop.f32.mrf.mxu2  ;;  %v1191_v13 = vpop.f32.mrf.mxu3  ;;  %v1213_v19 = vsel %vm1212_vm15, %v1999_v62, %v1209_v10  ;;  %vm1227_vm4 = vmor %vm1225_vm2, %vm1226_vm1 }
 0x1aa   :  { %v1222_v14 = vsub.f32 1.0, %v1221_v32  ;;  %v1218_v25 = vsel %vm1215_vm3, %v1217_v23, %v1213_v19 }
 0x1ab   :  { %2006 = vrcp.f32 %v1204_v11  ;;  %v1246_v36 = vand.u32 2147483648, %v1204_v11  ;;  %v1244_v38 = vand.u32 2147483647, %v1204_v11  ;;  %vm1240_vm7 = vweird.f32 %v1204_v11 }
 0x1ac   :  { %v1223_v18 = vmul.f32 %v2001_v8, %v1222_v14  ;;  %v2005_v56 = vpop.eup %2004 }
 0x1ad   :  { %v1254_v33 = vmul.f32 %v2005_v56, %v1218_v25  ;;  %v1247_v40 = vor.u32 1.1754944e-38, %v1246_v36  ;;  %vm1245_vm9 = vcmp.eq.f32.partialorder %v1244_v38, 8.507059e+37 }
 0x1ae   :  { %v1224_v24 = vadd.f32 %v2001_v8, %v1223_v18 }
 0x1b0   :  { %v1228_v27 = vsel %vm1227_vm4, %v2001_v8, %v1224_v24 }
 0x1b1   :  { %v2007_v28 = vpop.eup %2006  ;;  %v1233_v29 = vsel %vm1230_vm5, %v1232_v20, %v1228_v27 }
 0x1b2   :  { %v1236_v30 = vmul.f32 %v2007_v28, %v1204_v11  ;;  %v1253_v31 = vmul.f32 %v1252_v26, %v1233_v29  ;;  %vm1241_vm6 = vweird.f32 %v2007_v28 }
 0x1b3   :  { %vm1242_vm8 = vmor %vm1240_vm7, %vm1241_vm6 }
 0x1b4   :  { %v1237_v34 = vsub.f32 1.0, %v1236_v30  ;;  %v1255_v35 = vadd.f32 %v1254_v33, %v1253_v31 }
 0x1b6   :  { %2008 = vtanh.f32 %v1255_v35  ;;  %1261 = vst [vmem:[#allocation15 + $0x2] sm:$0x3] %v1255_v35  ;;  %v1238_v37 = vmul.f32 %v2007_v28, %v1237_v34 }
 0x1b8   :  { %v1239_v9 = vadd.f32 %v2007_v28, %v1238_v37 }
 0x1ba   :  { %v1243_v41 = vsel %vm1242_vm8, %v2007_v28, %v1239_v9 }
 0x1bb   :  { %v1248_v42 = vsel %vm1245_vm9, %v1247_v40, %v1243_v41 }
 0x1bc   :  { %v2009_v43 = vpop.eup %2008 }
 0x1bd   :  { %v1257_v44 = vmul.f32 %v2009_v43, %v1248_v42 }
 0x1bf   :  { %1259 = vst [vmem:[#allocation13 + $0x2] sm:$0x3] %v1257_v44 }
 0x1c0   :  { %1286 = dma.vmem_to_hbm [thread:$0]  %s1279_s4, 64, %s1281_s8, [#allocation14], %s2213_s9, %s2213_s9, %s2214_s10   ;;  %1262 = vst.msk [vmem:[#allocation12] sm:$0x3] %vm103_vm0, %v1257_v44 }
 0x1c1   :  { %1273 = dma.vmem_to_hbm [thread:$0]  %s1269_s12, 32, %s1271_s14, [#allocation5]  }
 0x1c2   :  { %1299 = dma.vmem_to_hbm [thread:$0]  %s1292_s16, 64, %s1294_s18, [#allocation14], %s2213_s9, %s2213_s9, %s2214_s10  }
 0x1c3   :  { %2208 = dma.done.wait [#allocation5], 32  }
 0x1c4   :  { %2209 = vsyncadd [#allocation5], 4294967264 }
 0x1c5   :  { %2210 = dma.done.wait [#allocation14], 128  }
 0x1c6   :  { %2211 = vsyncadd [#allocation14], 4294967168 }
 0x1c7   :  { %1312 = vsyncpa [#allocation4], 1 }
 0x1c8   :  { %1313 = vsyncpa [#allocation7], 1 }
 0x1c9   :  { %1314 = vsyncpa [#allocation10], 1 }
 0x1ca   :  { %1315 = vsyncpa [#allocation5], 1 }
 0x1cb   :  { %1316 = vsyncpa [#allocation14], 1 }

</bundles_post_ra>
